<compile_context>
chip_gen: v5e
topology: v5e:2x2
jax: 0.10.0
libtpu: 0.0.40
codegen_flags: <defaults>
</compile_context>

<pallas_src>
import functools

import jax
import jax.numpy as jnp
from jax.experimental import pallas as pl
from jax.experimental.pallas import tpu as pltpu


def _smooth_l1(d):
    ad = jnp.abs(d)
    return jnp.where(ad < 1.0, 0.5 * d * d, ad - 0.5)


def _ssd_loss_kernel(dbp_ref, ploc_ref, gloc_ref, plabel_ref, glabel_ref,
                     out_ref, *, scale_xy, scale_wh):
    dbp = dbp_ref[...]            # (4, A): rows 0-1 = xy, rows 2-3 = 1/wh
    ploc = ploc_ref[...]          # (B, 4, A)
    gloc = gloc_ref[...]          # (B, 4, A)
    plabel = plabel_ref[...]      # (B, C, A) logits
    glabel = glabel_ref[...]      # (B, A) int32

    bt, num_classes, num_anchors = plabel.shape

    db_xy = dbp[:2, :][None]      # (1, 2, A)
    db_iwh = dbp[2:, :][None]     # (1, 2, A)  == 1/wh (precomputed in wrapper)

    # ---- _location_vec (divides replaced by multiplies) -------------------
    gxy = scale_xy * (gloc[:, :2, :] - db_xy) * db_iwh            # (B, 2, A)
    gwh = scale_wh * jnp.log(gloc[:, 2:, :] * db_iwh)             # (B, 2, A)

    # ---- SmoothL1 (beta = 1), summed over the 4 box coords -----------------
    sl1 = (jnp.sum(_smooth_l1(ploc[:, :2, :] - gxy), axis=1) +
           jnp.sum(_smooth_l1(ploc[:, 2:, :] - gwh), axis=1))     # (B, A)

    mask = glabel > 0                                             # (B, A)
    maskf = mask.astype(jnp.float32)
    pos_num = jnp.sum(maskf, axis=-1, keepdims=True)              # (B, 1)
    loc_loss = jnp.sum(maskf * sl1, axis=-1, keepdims=True)       # (B, 1)

    # ---- per-anchor cross entropy: logsumexp(logits) - logits[label] -------
    m = jnp.max(plabel, axis=1)                                               # (B, A)
    lse = m + jnp.log(jnp.sum(jnp.exp(plabel - m[:, None, :]), axis=1))       # (B, A)
    cls_ids = jax.lax.broadcasted_iota(jnp.int32, (bt, num_classes, num_anchors), 1)
    onehot = (cls_ids == glabel[:, None, :]).astype(jnp.float32)              # (B, C, A)
    picked = jnp.sum(plabel * onehot, axis=1)                                 # (B, A)
    con = lse - picked                                                        # (B, A)

    con_pos = jnp.sum(con * maskf, axis=-1, keepdims=True)        # positives' CE

    # ---- hard negative mining via exact k-th-largest bit search ------------
    # con_neg >= 0 (CE is non-negative; clamp for bit-order robustness), so
    # int32 bit-pattern ordering == float ordering.
    con_neg = jnp.where(mask, 0.0, jnp.maximum(con, 0.0))         # (B, A)
    cb = pltpu.bitcast(con_neg, jnp.int32)                        # (B, A)
    k = jnp.minimum(3.0 * pos_num, float(num_anchors))            # (B, 1)

    prefix = jnp.zeros((bt, 1), jnp.int32)
    for bit in range(30, -1, -1):                                 # skip sign bit
        trial = prefix | jnp.int32(1 << bit)
        cnt = jnp.sum((cb >= trial).astype(jnp.float32), axis=-1, keepdims=True)
        prefix = jnp.where(cnt >= k, trial, prefix)
    # prefix now holds the bit pattern of the k-th largest con_neg value.

    gt = (cb > prefix).astype(jnp.float32)                        # strictly-above threshold
    c_gt = jnp.sum(gt, axis=-1, keepdims=True)                    # (B, 1)
    s_gt = jnp.sum(con_neg * gt, axis=-1, keepdims=True)          # (B, 1)
    t_val = jnp.max(jnp.where(cb == prefix, con_neg, 0.0),
                    axis=-1, keepdims=True)                       # exact k-th value

    con_loss = con_pos + s_gt + (k - c_gt) * t_val                # (B, 1)

    total = loc_loss + con_loss
    num_mask = (pos_num > 0.0).astype(jnp.float32)
    denom = jnp.maximum(pos_num, 1e-6)
    loss = total * num_mask / denom                               # (B, 1)

    out_ref[...] = jnp.broadcast_to(loss, (bt, 128))


def _pick_batch_tile(n, c, a):
    """Largest divisor of n (<= 8) whose double-buffered block fits ~32 MiB."""
    per_sample_bytes = (9 + c) * a * 4
    cap = min(8, max(1, int((16 * 2**20) // per_sample_bytes)))
    bt = 1
    for d in range(1, min(n, cap) + 1):
        if n % d == 0:
            bt = d
    return bt


def ssd_loss(ploc, plabel, gloc, glabel, dboxes, *, scale_xy=10.0, scale_wh=5.0):
    """Pallas SSD loss. Returns the scalar batch-mean loss."""
    n, _, a = ploc.shape
    c = plabel.shape[1]
    bt = _pick_batch_tile(n, c, a)

    # Hoisted dbox constants: [xy ; 1/wh]  (turns per-step divides into muls).
    dbp = jnp.concatenate([dboxes[:2, :], 1.0 / dboxes[2:, :]], axis=0).astype(jnp.float32)

    kernel = functools.partial(_ssd_loss_kernel,
                               scale_xy=float(scale_xy), scale_wh=float(scale_wh))

    step_bytes = (bt * (9 + c) * a + 4 * a + bt * 128) * 4
    vmem_limit = int(min(64 * 2**20, max(8 * 2**20, 6 * step_bytes)))

    cost = pl.CostEstimate(
        flops=int(n * a * (3 * c + 160)),
        transcendentals=int(n * a * (c + 3)),
        bytes_accessed=int((n * (9 + c) * a + 4 * a + n * 128) * 4),
    )

    per_sample = pl.pallas_call(
        kernel,
        out_shape=jax.ShapeDtypeStruct((n, 128), jnp.float32),
        grid_spec=pltpu.PrefetchScalarGridSpec(
            num_scalar_prefetch=0,
            grid=(n // bt,),
            in_specs=[
                pl.BlockSpec((4, a), lambda b: (0, 0)),           # prepared dboxes (shared)
                pl.BlockSpec((bt, 4, a), lambda b: (b, 0, 0)),    # ploc
                pl.BlockSpec((bt, 4, a), lambda b: (b, 0, 0)),    # gloc
                pl.BlockSpec((bt, c, a), lambda b: (b, 0, 0)),    # plabel
                pl.BlockSpec((bt, a), lambda b: (b, 0)),          # glabel
            ],
            out_specs=pl.BlockSpec((bt, 128), lambda b: (b, 0)),  # per-step-owned block
        ),
        compiler_params=pltpu.CompilerParams(
            dimension_semantics=("parallel",),
            vmem_limit_bytes=vmem_limit),
        cost_estimate=cost,
    )(dbp, ploc, gloc, plabel, glabel)

    return jnp.mean(per_sample[:, 0])


def ssd_loss_ref(ploc, plabel, gloc, glabel, dboxes, *, scale_xy=10.0, scale_wh=5.0):
    """Pure-JAX reference mirroring the PyTorch forward (argsort-based mining)."""
    a = ploc.shape[-1]
    db = dboxes[None]                                              # (1, 4, A)
    mask = glabel > 0
    pos_num = jnp.sum(mask, axis=1)

    gxy = scale_xy * (gloc[:, :2, :] - db[:, :2, :]) / db[:, 2:, :]
    gwh = scale_wh * jnp.log(gloc[:, 2:, :] / db[:, 2:, :])
    vec_gd = jnp.concatenate([gxy, gwh], axis=1)
    d = ploc - vec_gd
    ad = jnp.abs(d)
    sl1 = jnp.where(ad < 1.0, 0.5 * d * d, ad - 0.5)
    loc_loss = jnp.sum(mask.astype(jnp.float32) * jnp.sum(sl1, axis=1), axis=1)

    lse = jax.scipy.special.logsumexp(plabel, axis=1)
    picked = jnp.take_along_axis(plabel, glabel[:, None, :], axis=1)[:, 0, :]
    con = lse - picked
    con_neg = jnp.where(mask, 0.0, con)
    con_idx = jnp.argsort(-con_neg, axis=1)
    con_rank = jnp.argsort(con_idx, axis=1)
    neg_num = jnp.minimum(3 * pos_num, a)[:, None]
    neg_mask = con_rank < neg_num
    con_loss = jnp.sum(con * (mask | neg_mask).astype(jnp.float32), axis=1)

    total = loc_loss + con_loss
    num_mask = (pos_num > 0).astype(jnp.float32)
    pn = jnp.maximum(pos_num.astype(jnp.float32), 1e-6)
    return jnp.mean(total * num_mask / pn)


if __name__ == "__main__":
    N, A, C = 2, 256, 8                      # batch, anchors, classes (incl. background)
    key = jax.random.PRNGKey(0)
    k1, k2, k3, k4, k5, k6, k7, k8 = jax.random.split(key, 8)

    # Deterministic synthetic "default boxes" parameter (xywh, positive wh).
    db_xy = jax.random.uniform(k1, (2, A), minval=0.05, maxval=0.95)
    db_wh = jax.random.uniform(k2, (2, A), minval=0.10, maxval=0.90)
    dboxes = jnp.concatenate([db_xy, db_wh], axis=0).astype(jnp.float32)

    ploc = (0.5 * jax.random.normal(k3, (N, 4, A))).astype(jnp.float32)
    gl_xy = jax.random.uniform(k4, (N, 2, A), minval=0.0, maxval=1.0)
    gl_wh = jax.random.uniform(k5, (N, 2, A), minval=0.10, maxval=1.0)
    gloc = jnp.concatenate([gl_xy, gl_wh], axis=1).astype(jnp.float32)
    plabel = jax.random.normal(k6, (N, C, A)).astype(jnp.float32)
    is_pos = jax.random.bernoulli(k7, 0.25, (N, A))
    cls = jax.random.randint(k8, (N, A), 1, C)
    glabel = jnp.where(is_pos, cls, 0).astype(jnp.int32)

    out = jax.block_until_ready(ssd_loss(ploc, plabel, gloc, glabel, dboxes))
    ref = ssd_loss_ref(ploc, plabel, gloc, glabel, dboxes)
    assert bool(jnp.isfinite(out)), "kernel produced non-finite loss"
    assert abs(float(out) - float(ref)) <= 1e-3 * max(1.0, abs(float(ref))), (
        f"mismatch: kernel={float(out)} ref={float(ref)}")

    # All-background batch (pos_num == 0 path; k == 0 in the bit search).
    glabel0 = jnp.zeros((N, A), jnp.int32)
    out0 = jax.block_until_ready(ssd_loss(ploc, plabel, gloc, glabel0, dboxes))
    ref0 = ssd_loss_ref(ploc, plabel, gloc, glabel0, dboxes)
    assert bool(jnp.isfinite(out0)), "kernel produced non-finite loss (no positives)"
    assert abs(float(out0) - float(ref0)) <= 1e-5, (
        f"mismatch (no positives): kernel={float(out0)} ref={float(ref0)}")

    print("KERNEL_OK")
</pallas_src>

<mosaic_0001>
module attributes {stable_mosaic.version = 11 : i64} {
  func.func @_ssd_loss_kernel(%arg0: i32, %arg1: memref<4x256xf32, #tpu.memory_space<vmem>>, %arg2: memref<2x4x256xf32, #tpu.memory_space<vmem>>, %arg3: memref<2x4x256xf32, #tpu.memory_space<vmem>>, %arg4: memref<2x8x256xf32, #tpu.memory_space<vmem>>, %arg5: memref<2x256xi32, #tpu.memory_space<vmem>>, %arg6: memref<2x128xf32, #tpu.memory_space<vmem>>) attributes {dimension_semantics = [#tpu.dimension_semantics<parallel>], iteration_bounds = array<i64: 1>, scalar_prefetch = 0 : i64, scratch_operands = 0 : i64, tpu.core_type = #tpu.core_type<tc>, window_params = [{pipeline_mode = #tpu.pipeline_mode<synchronous>, transform_indices = @transform_0, window_bounds = array<i64: 4, 256>}, {transform_indices = @transform_1, window_bounds = array<i64: 2, 4, 256>}, {transform_indices = @transform_2, window_bounds = array<i64: 2, 4, 256>}, {transform_indices = @transform_3, window_bounds = array<i64: 2, 8, 256>}, {transform_indices = @transform_4, window_bounds = array<i64: 2, 256>}, {transform_indices = @transform_5, window_bounds = array<i64: 2, 128>}]} {
    %c0 = arith.constant 0 : index
    %c0_0 = arith.constant 0 : index
    %0 = vector.load %arg1[%c0, %c0_0] : memref<4x256xf32, #tpu.memory_space<vmem>>, vector<4x256xf32>
    %c0_1 = arith.constant 0 : index
    %c0_2 = arith.constant 0 : index
    %c0_3 = arith.constant 0 : index
    %1 = vector.load %arg2[%c0_1, %c0_2, %c0_3] : memref<2x4x256xf32, #tpu.memory_space<vmem>>, vector<2x4x256xf32>
    %c0_4 = arith.constant 0 : index
    %c0_5 = arith.constant 0 : index
    %c0_6 = arith.constant 0 : index
    %2 = vector.load %arg3[%c0_4, %c0_5, %c0_6] : memref<2x4x256xf32, #tpu.memory_space<vmem>>, vector<2x4x256xf32>
    %c0_7 = arith.constant 0 : index
    %c0_8 = arith.constant 0 : index
    %c0_9 = arith.constant 0 : index
    %3 = vector.load %arg4[%c0_7, %c0_8, %c0_9] : memref<2x8x256xf32, #tpu.memory_space<vmem>>, vector<2x8x256xf32>
    %c0_10 = arith.constant 0 : index
    %c0_11 = arith.constant 0 : index
    %4 = vector.load %arg5[%c0_10, %c0_11] : memref<2x256xi32, #tpu.memory_space<vmem>>, vector<2x256xi32>
    %5 = vector.extract_strided_slice %0 {offsets = [0, 0], sizes = [2, 256], strides = [1, 1]} : vector<4x256xf32> to vector<2x256xf32>
    %6 = vector.shape_cast %5 : vector<2x256xf32> to vector<1x2x256xf32>
    %7 = vector.extract_strided_slice %0 {offsets = [2, 0], sizes = [2, 256], strides = [1, 1]} : vector<4x256xf32> to vector<2x256xf32>
    %8 = vector.shape_cast %7 : vector<2x256xf32> to vector<1x2x256xf32>
    %9 = vector.extract_strided_slice %2 {offsets = [0, 0, 0], sizes = [2, 2, 256], strides = [1, 1, 1]} : vector<2x4x256xf32> to vector<2x2x256xf32>
    %10 = vector.broadcast %6 : vector<1x2x256xf32> to vector<2x2x256xf32>
    %11 = arith.subf %9, %10 : vector<2x2x256xf32>
    %cst = arith.constant 1.000000e+01 : f32
    %12 = vector.broadcast %cst : f32 to vector<2x2x256xf32>
    %13 = arith.mulf %12, %11 : vector<2x2x256xf32>
    %14 = vector.broadcast %8 : vector<1x2x256xf32> to vector<2x2x256xf32>
    %15 = arith.mulf %13, %14 : vector<2x2x256xf32>
    %16 = vector.extract_strided_slice %2 {offsets = [0, 2, 0], sizes = [2, 2, 256], strides = [1, 1, 1]} : vector<2x4x256xf32> to vector<2x2x256xf32>
    %17 = vector.broadcast %8 : vector<1x2x256xf32> to vector<2x2x256xf32>
    %18 = arith.mulf %16, %17 : vector<2x2x256xf32>
    %19 = math.log %18 : vector<2x2x256xf32>
    %cst_12 = arith.constant 5.000000e+00 : f32
    %20 = vector.broadcast %cst_12 : f32 to vector<2x2x256xf32>
    %21 = arith.mulf %20, %19 : vector<2x2x256xf32>
    %22 = vector.extract_strided_slice %1 {offsets = [0, 0, 0], sizes = [2, 2, 256], strides = [1, 1, 1]} : vector<2x4x256xf32> to vector<2x2x256xf32>
    %23 = arith.subf %22, %15 : vector<2x2x256xf32>
    %24 = math.absf %23 : vector<2x2x256xf32>
    %cst_13 = arith.constant 1.000000e+00 : f32
    %25 = vector.broadcast %cst_13 : f32 to vector<2x2x256xf32>
    %26 = arith.cmpf olt, %24, %25 : vector<2x2x256xf32>
    %cst_14 = arith.constant 5.000000e-01 : f32
    %27 = vector.broadcast %cst_14 : f32 to vector<2x2x256xf32>
    %28 = arith.mulf %27, %23 : vector<2x2x256xf32>
    %29 = arith.mulf %28, %23 : vector<2x2x256xf32>
    %cst_15 = arith.constant 5.000000e-01 : f32
    %30 = vector.broadcast %cst_15 : f32 to vector<2x2x256xf32>
    %31 = arith.subf %24, %30 : vector<2x2x256xf32>
    %32 = arith.select %26, %29, %31 : vector<2x2x256xi1>, vector<2x2x256xf32>
    %cst_16 = arith.constant dense<0.000000e+00> : vector<2x256xf32>
    %33 = vector.multi_reduction <add>, %32, %cst_16 [1] : vector<2x2x256xf32> to vector<2x256xf32>
    %34 = vector.extract_strided_slice %1 {offsets = [0, 2, 0], sizes = [2, 2, 256], strides = [1, 1, 1]} : vector<2x4x256xf32> to vector<2x2x256xf32>
    %35 = arith.subf %34, %21 : vector<2x2x256xf32>
    %36 = math.absf %35 : vector<2x2x256xf32>
    %cst_17 = arith.constant 1.000000e+00 : f32
    %37 = vector.broadcast %cst_17 : f32 to vector<2x2x256xf32>
    %38 = arith.cmpf olt, %36, %37 : vector<2x2x256xf32>
    %cst_18 = arith.constant 5.000000e-01 : f32
    %39 = vector.broadcast %cst_18 : f32 to vector<2x2x256xf32>
    %40 = arith.mulf %39, %35 : vector<2x2x256xf32>
    %41 = arith.mulf %40, %35 : vector<2x2x256xf32>
    %cst_19 = arith.constant 5.000000e-01 : f32
    %42 = vector.broadcast %cst_19 : f32 to vector<2x2x256xf32>
    %43 = arith.subf %36, %42 : vector<2x2x256xf32>
    %44 = arith.select %38, %41, %43 : vector<2x2x256xi1>, vector<2x2x256xf32>
    %cst_20 = arith.constant dense<0.000000e+00> : vector<2x256xf32>
    %45 = vector.multi_reduction <add>, %44, %cst_20 [1] : vector<2x2x256xf32> to vector<2x256xf32>
    %46 = arith.addf %33, %45 : vector<2x256xf32>
    %c0_i32 = arith.constant 0 : i32
    %47 = vector.broadcast %c0_i32 : i32 to vector<2x256xi32>
    %48 = arith.cmpi sgt, %4, %47 : vector<2x256xi32>
    %49 = arith.extui %48 : vector<2x256xi1> to vector<2x256xi32>
    %50 = arith.sitofp %49 : vector<2x256xi32> to vector<2x256xf32>
    %cst_21 = arith.constant dense<0.000000e+00> : vector<2xf32>
    %51 = vector.multi_reduction <add>, %50, %cst_21 [1] : vector<2x256xf32> to vector<2xf32>
    %52 = vector.shape_cast %51 : vector<2xf32> to vector<2x1xf32>
    %53 = arith.mulf %50, %46 : vector<2x256xf32>
    %cst_22 = arith.constant dense<0.000000e+00> : vector<2xf32>
    %54 = vector.multi_reduction <add>, %53, %cst_22 [1] : vector<2x256xf32> to vector<2xf32>
    %55 = vector.shape_cast %54 : vector<2xf32> to vector<2x1xf32>
    %cst_23 = arith.constant dense<0xFF800000> : vector<2x256xf32>
    %56 = vector.multi_reduction <maximumf>, %3, %cst_23 [1] : vector<2x8x256xf32> to vector<2x256xf32>
    %57 = vector.shape_cast %56 : vector<2x256xf32> to vector<2x1x256xf32>
    %58 = vector.broadcast %57 : vector<2x1x256xf32> to vector<2x8x256xf32>
    %59 = arith.subf %3, %58 : vector<2x8x256xf32>
    %60 = math.exp %59 : vector<2x8x256xf32>
    %cst_24 = arith.constant dense<0.000000e+00> : vector<2x256xf32>
    %61 = vector.multi_reduction <add>, %60, %cst_24 [1] : vector<2x8x256xf32> to vector<2x256xf32>
    %62 = math.log %61 : vector<2x256xf32>
    %63 = arith.addf %56, %62 : vector<2x256xf32>
    %64 = tpu.iota {dimensions = array<i32: 1>} : vector<2x8x256xi32>
    %65 = vector.shape_cast %4 : vector<2x256xi32> to vector<2x1x256xi32>
    %66 = vector.broadcast %65 : vector<2x1x256xi32> to vector<2x8x256xi32>
    %67 = arith.cmpi eq, %64, %66 : vector<2x8x256xi32>
    %68 = arith.extui %67 : vector<2x8x256xi1> to vector<2x8x256xi32>
    %69 = arith.sitofp %68 : vector<2x8x256xi32> to vector<2x8x256xf32>
    %70 = arith.mulf %3, %69 : vector<2x8x256xf32>
    %cst_25 = arith.constant dense<0.000000e+00> : vector<2x256xf32>
    %71 = vector.multi_reduction <add>, %70, %cst_25 [1] : vector<2x8x256xf32> to vector<2x256xf32>
    %72 = arith.subf %63, %71 : vector<2x256xf32>
    %73 = arith.mulf %72, %50 : vector<2x256xf32>
    %cst_26 = arith.constant dense<0.000000e+00> : vector<2xf32>
    %74 = vector.multi_reduction <add>, %73, %cst_26 [1] : vector<2x256xf32> to vector<2xf32>
    %75 = vector.shape_cast %74 : vector<2xf32> to vector<2x1xf32>
    %cst_27 = arith.constant 0.000000e+00 : f32
    %76 = vector.broadcast %cst_27 : f32 to vector<2x256xf32>
    %77 = arith.maximumf %72, %76 : vector<2x256xf32>
    %cst_28 = arith.constant 0.000000e+00 : f32
    %78 = vector.broadcast %cst_28 : f32 to vector<2x256xf32>
    %79 = arith.select %48, %78, %77 : vector<2x256xi1>, vector<2x256xf32>
    %80 = tpu.bitcast %79 : vector<2x256xf32> -> vector<2x256xi32>
    %cst_29 = arith.constant 3.000000e+00 : f32
    %81 = vector.broadcast %cst_29 : f32 to vector<2x1xf32>
    %82 = arith.mulf %81, %52 : vector<2x1xf32>
    %cst_30 = arith.constant 2.560000e+02 : f32
    %83 = vector.broadcast %cst_30 : f32 to vector<2x1xf32>
    %84 = arith.minimumf %82, %83 : vector<2x1xf32>
    %c0_i32_31 = arith.constant 0 : i32
    %85 = vector.broadcast %c0_i32_31 : i32 to vector<2x1xi32>
    %c1073741824_i32 = arith.constant 1073741824 : i32
    %86 = vector.broadcast %c1073741824_i32 : i32 to vector<2x1xi32>
    %87 = arith.ori %85, %86 : vector<2x1xi32>
    %88 = vector.broadcast %87 : vector<2x1xi32> to vector<2x256xi32>
    %89 = arith.cmpi sge, %80, %88 : vector<2x256xi32>
    %90 = arith.extui %89 : vector<2x256xi1> to vector<2x256xi32>
    %91 = arith.sitofp %90 : vector<2x256xi32> to vector<2x256xf32>
    %cst_32 = arith.constant dense<0.000000e+00> : vector<2xf32>
    %92 = vector.multi_reduction <add>, %91, %cst_32 [1] : vector<2x256xf32> to vector<2xf32>
    %93 = vector.shape_cast %92 : vector<2xf32> to vector<2x1xf32>
    %94 = arith.cmpf oge, %93, %84 : vector<2x1xf32>
    %95 = arith.select %94, %87, %85 : vector<2x1xi1>, vector<2x1xi32>
    %c536870912_i32 = arith.constant 536870912 : i32
    %96 = vector.broadcast %c536870912_i32 : i32 to vector<2x1xi32>
    %97 = arith.ori %95, %96 : vector<2x1xi32>
    %98 = vector.broadcast %97 : vector<2x1xi32> to vector<2x256xi32>
    %99 = arith.cmpi sge, %80, %98 : vector<2x256xi32>
    %100 = arith.extui %99 : vector<2x256xi1> to vector<2x256xi32>
    %101 = arith.sitofp %100 : vector<2x256xi32> to vector<2x256xf32>
    %cst_33 = arith.constant dense<0.000000e+00> : vector<2xf32>
    %102 = vector.multi_reduction <add>, %101, %cst_33 [1] : vector<2x256xf32> to vector<2xf32>
    %103 = vector.shape_cast %102 : vector<2xf32> to vector<2x1xf32>
    %104 = arith.cmpf oge, %103, %84 : vector<2x1xf32>
    %105 = arith.select %104, %97, %95 : vector<2x1xi1>, vector<2x1xi32>
    %c268435456_i32 = arith.constant 268435456 : i32
    %106 = vector.broadcast %c268435456_i32 : i32 to vector<2x1xi32>
    %107 = arith.ori %105, %106 : vector<2x1xi32>
    %108 = vector.broadcast %107 : vector<2x1xi32> to vector<2x256xi32>
    %109 = arith.cmpi sge, %80, %108 : vector<2x256xi32>
    %110 = arith.extui %109 : vector<2x256xi1> to vector<2x256xi32>
    %111 = arith.sitofp %110 : vector<2x256xi32> to vector<2x256xf32>
    %cst_34 = arith.constant dense<0.000000e+00> : vector<2xf32>
    %112 = vector.multi_reduction <add>, %111, %cst_34 [1] : vector<2x256xf32> to vector<2xf32>
    %113 = vector.shape_cast %112 : vector<2xf32> to vector<2x1xf32>
    %114 = arith.cmpf oge, %113, %84 : vector<2x1xf32>
    %115 = arith.select %114, %107, %105 : vector<2x1xi1>, vector<2x1xi32>
    %c134217728_i32 = arith.constant 134217728 : i32
    %116 = vector.broadcast %c134217728_i32 : i32 to vector<2x1xi32>
    %117 = arith.ori %115, %116 : vector<2x1xi32>
    %118 = vector.broadcast %117 : vector<2x1xi32> to vector<2x256xi32>
    %119 = arith.cmpi sge, %80, %118 : vector<2x256xi32>
    %120 = arith.extui %119 : vector<2x256xi1> to vector<2x256xi32>
    %121 = arith.sitofp %120 : vector<2x256xi32> to vector<2x256xf32>
    %cst_35 = arith.constant dense<0.000000e+00> : vector<2xf32>
    %122 = vector.multi_reduction <add>, %121, %cst_35 [1] : vector<2x256xf32> to vector<2xf32>
    %123 = vector.shape_cast %122 : vector<2xf32> to vector<2x1xf32>
    %124 = arith.cmpf oge, %123, %84 : vector<2x1xf32>
    %125 = arith.select %124, %117, %115 : vector<2x1xi1>, vector<2x1xi32>
    %c67108864_i32 = arith.constant 67108864 : i32
    %126 = vector.broadcast %c67108864_i32 : i32 to vector<2x1xi32>
    %127 = arith.ori %125, %126 : vector<2x1xi32>
    %128 = vector.broadcast %127 : vector<2x1xi32> to vector<2x256xi32>
    %129 = arith.cmpi sge, %80, %128 : vector<2x256xi32>
    %130 = arith.extui %129 : vector<2x256xi1> to vector<2x256xi32>
    %131 = arith.sitofp %130 : vector<2x256xi32> to vector<2x256xf32>
    %cst_36 = arith.constant dense<0.000000e+00> : vector<2xf32>
    %132 = vector.multi_reduction <add>, %131, %cst_36 [1] : vector<2x256xf32> to vector<2xf32>
    %133 = vector.shape_cast %132 : vector<2xf32> to vector<2x1xf32>
    %134 = arith.cmpf oge, %133, %84 : vector<2x1xf32>
    %135 = arith.select %134, %127, %125 : vector<2x1xi1>, vector<2x1xi32>
    %c33554432_i32 = arith.constant 33554432 : i32
    %136 = vector.broadcast %c33554432_i32 : i32 to vector<2x1xi32>
    %137 = arith.ori %135, %136 : vector<2x1xi32>
    %138 = vector.broadcast %137 : vector<2x1xi32> to vector<2x256xi32>
    %139 = arith.cmpi sge, %80, %138 : vector<2x256xi32>
    %140 = arith.extui %139 : vector<2x256xi1> to vector<2x256xi32>
    %141 = arith.sitofp %140 : vector<2x256xi32> to vector<2x256xf32>
    %cst_37 = arith.constant dense<0.000000e+00> : vector<2xf32>
    %142 = vector.multi_reduction <add>, %141, %cst_37 [1] : vector<2x256xf32> to vector<2xf32>
    %143 = vector.shape_cast %142 : vector<2xf32> to vector<2x1xf32>
    %144 = arith.cmpf oge, %143, %84 : vector<2x1xf32>
    %145 = arith.select %144, %137, %135 : vector<2x1xi1>, vector<2x1xi32>
    %c16777216_i32 = arith.constant 16777216 : i32
    %146 = vector.broadcast %c16777216_i32 : i32 to vector<2x1xi32>
    %147 = arith.ori %145, %146 : vector<2x1xi32>
    %148 = vector.broadcast %147 : vector<2x1xi32> to vector<2x256xi32>
    %149 = arith.cmpi sge, %80, %148 : vector<2x256xi32>
    %150 = arith.extui %149 : vector<2x256xi1> to vector<2x256xi32>
    %151 = arith.sitofp %150 : vector<2x256xi32> to vector<2x256xf32>
    %cst_38 = arith.constant dense<0.000000e+00> : vector<2xf32>
    %152 = vector.multi_reduction <add>, %151, %cst_38 [1] : vector<2x256xf32> to vector<2xf32>
    %153 = vector.shape_cast %152 : vector<2xf32> to vector<2x1xf32>
    %154 = arith.cmpf oge, %153, %84 : vector<2x1xf32>
    %155 = arith.select %154, %147, %145 : vector<2x1xi1>, vector<2x1xi32>
    %c8388608_i32 = arith.constant 8388608 : i32
    %156 = vector.broadcast %c8388608_i32 : i32 to vector<2x1xi32>
    %157 = arith.ori %155, %156 : vector<2x1xi32>
    %158 = vector.broadcast %157 : vector<2x1xi32> to vector<2x256xi32>
    %159 = arith.cmpi sge, %80, %158 : vector<2x256xi32>
    %160 = arith.extui %159 : vector<2x256xi1> to vector<2x256xi32>
    %161 = arith.sitofp %160 : vector<2x256xi32> to vector<2x256xf32>
    %cst_39 = arith.constant dense<0.000000e+00> : vector<2xf32>
    %162 = vector.multi_reduction <add>, %161, %cst_39 [1] : vector<2x256xf32> to vector<2xf32>
    %163 = vector.shape_cast %162 : vector<2xf32> to vector<2x1xf32>
    %164 = arith.cmpf oge, %163, %84 : vector<2x1xf32>
    %165 = arith.select %164, %157, %155 : vector<2x1xi1>, vector<2x1xi32>
    %c4194304_i32 = arith.constant 4194304 : i32
    %166 = vector.broadcast %c4194304_i32 : i32 to vector<2x1xi32>
    %167 = arith.ori %165, %166 : vector<2x1xi32>
    %168 = vector.broadcast %167 : vector<2x1xi32> to vector<2x256xi32>
    %169 = arith.cmpi sge, %80, %168 : vector<2x256xi32>
    %170 = arith.extui %169 : vector<2x256xi1> to vector<2x256xi32>
    %171 = arith.sitofp %170 : vector<2x256xi32> to vector<2x256xf32>
    %cst_40 = arith.constant dense<0.000000e+00> : vector<2xf32>
    %172 = vector.multi_reduction <add>, %171, %cst_40 [1] : vector<2x256xf32> to vector<2xf32>
    %173 = vector.shape_cast %172 : vector<2xf32> to vector<2x1xf32>
    %174 = arith.cmpf oge, %173, %84 : vector<2x1xf32>
    %175 = arith.select %174, %167, %165 : vector<2x1xi1>, vector<2x1xi32>
    %c2097152_i32 = arith.constant 2097152 : i32
    %176 = vector.broadcast %c2097152_i32 : i32 to vector<2x1xi32>
    %177 = arith.ori %175, %176 : vector<2x1xi32>
    %178 = vector.broadcast %177 : vector<2x1xi32> to vector<2x256xi32>
    %179 = arith.cmpi sge, %80, %178 : vector<2x256xi32>
    %180 = arith.extui %179 : vector<2x256xi1> to vector<2x256xi32>
    %181 = arith.sitofp %180 : vector<2x256xi32> to vector<2x256xf32>
    %cst_41 = arith.constant dense<0.000000e+00> : vector<2xf32>
    %182 = vector.multi_reduction <add>, %181, %cst_41 [1] : vector<2x256xf32> to vector<2xf32>
    %183 = vector.shape_cast %182 : vector<2xf32> to vector<2x1xf32>
    %184 = arith.cmpf oge, %183, %84 : vector<2x1xf32>
    %185 = arith.select %184, %177, %175 : vector<2x1xi1>, vector<2x1xi32>
    %c1048576_i32 = arith.constant 1048576 : i32
    %186 = vector.broadcast %c1048576_i32 : i32 to vector<2x1xi32>
    %187 = arith.ori %185, %186 : vector<2x1xi32>
    %188 = vector.broadcast %187 : vector<2x1xi32> to vector<2x256xi32>
    %189 = arith.cmpi sge, %80, %188 : vector<2x256xi32>
    %190 = arith.extui %189 : vector<2x256xi1> to vector<2x256xi32>
    %191 = arith.sitofp %190 : vector<2x256xi32> to vector<2x256xf32>
    %cst_42 = arith.constant dense<0.000000e+00> : vector<2xf32>
    %192 = vector.multi_reduction <add>, %191, %cst_42 [1] : vector<2x256xf32> to vector<2xf32>
    %193 = vector.shape_cast %192 : vector<2xf32> to vector<2x1xf32>
    %194 = arith.cmpf oge, %193, %84 : vector<2x1xf32>
    %195 = arith.select %194, %187, %185 : vector<2x1xi1>, vector<2x1xi32>
    %c524288_i32 = arith.constant 524288 : i32
    %196 = vector.broadcast %c524288_i32 : i32 to vector<2x1xi32>
    %197 = arith.ori %195, %196 : vector<2x1xi32>
    %198 = vector.broadcast %197 : vector<2x1xi32> to vector<2x256xi32>
    %199 = arith.cmpi sge, %80, %198 : vector<2x256xi32>
    %200 = arith.extui %199 : vector<2x256xi1> to vector<2x256xi32>
    %201 = arith.sitofp %200 : vector<2x256xi32> to vector<2x256xf32>
    %cst_43 = arith.constant dense<0.000000e+00> : vector<2xf32>
    %202 = vector.multi_reduction <add>, %201, %cst_43 [1] : vector<2x256xf32> to vector<2xf32>
    %203 = vector.shape_cast %202 : vector<2xf32> to vector<2x1xf32>
    %204 = arith.cmpf oge, %203, %84 : vector<2x1xf32>
    %205 = arith.select %204, %197, %195 : vector<2x1xi1>, vector<2x1xi32>
    %c262144_i32 = arith.constant 262144 : i32
    %206 = vector.broadcast %c262144_i32 : i32 to vector<2x1xi32>
    %207 = arith.ori %205, %206 : vector<2x1xi32>
    %208 = vector.broadcast %207 : vector<2x1xi32> to vector<2x256xi32>
    %209 = arith.cmpi sge, %80, %208 : vector<2x256xi32>
    %210 = arith.extui %209 : vector<2x256xi1> to vector<2x256xi32>
    %211 = arith.sitofp %210 : vector<2x256xi32> to vector<2x256xf32>
    %cst_44 = arith.constant dense<0.000000e+00> : vector<2xf32>
    %212 = vector.multi_reduction <add>, %211, %cst_44 [1] : vector<2x256xf32> to vector<2xf32>
    %213 = vector.shape_cast %212 : vector<2xf32> to vector<2x1xf32>
    %214 = arith.cmpf oge, %213, %84 : vector<2x1xf32>
    %215 = arith.select %214, %207, %205 : vector<2x1xi1>, vector<2x1xi32>
    %c131072_i32 = arith.constant 131072 : i32
    %216 = vector.broadcast %c131072_i32 : i32 to vector<2x1xi32>
    %217 = arith.ori %215, %216 : vector<2x1xi32>
    %218 = vector.broadcast %217 : vector<2x1xi32> to vector<2x256xi32>
    %219 = arith.cmpi sge, %80, %218 : vector<2x256xi32>
    %220 = arith.extui %219 : vector<2x256xi1> to vector<2x256xi32>
    %221 = arith.sitofp %220 : vector<2x256xi32> to vector<2x256xf32>
    %cst_45 = arith.constant dense<0.000000e+00> : vector<2xf32>
    %222 = vector.multi_reduction <add>, %221, %cst_45 [1] : vector<2x256xf32> to vector<2xf32>
    %223 = vector.shape_cast %222 : vector<2xf32> to vector<2x1xf32>
    %224 = arith.cmpf oge, %223, %84 : vector<2x1xf32>
    %225 = arith.select %224, %217, %215 : vector<2x1xi1>, vector<2x1xi32>
    %c65536_i32 = arith.constant 65536 : i32
    %226 = vector.broadcast %c65536_i32 : i32 to vector<2x1xi32>
    %227 = arith.ori %225, %226 : vector<2x1xi32>
    %228 = vector.broadcast %227 : vector<2x1xi32> to vector<2x256xi32>
    %229 = arith.cmpi sge, %80, %228 : vector<2x256xi32>
    %230 = arith.extui %229 : vector<2x256xi1> to vector<2x256xi32>
    %231 = arith.sitofp %230 : vector<2x256xi32> to vector<2x256xf32>
    %cst_46 = arith.constant dense<0.000000e+00> : vector<2xf32>
    %232 = vector.multi_reduction <add>, %231, %cst_46 [1] : vector<2x256xf32> to vector<2xf32>
    %233 = vector.shape_cast %232 : vector<2xf32> to vector<2x1xf32>
    %234 = arith.cmpf oge, %233, %84 : vector<2x1xf32>
    %235 = arith.select %234, %227, %225 : vector<2x1xi1>, vector<2x1xi32>
    %c32768_i32 = arith.constant 32768 : i32
    %236 = vector.broadcast %c32768_i32 : i32 to vector<2x1xi32>
    %237 = arith.ori %235, %236 : vector<2x1xi32>
    %238 = vector.broadcast %237 : vector<2x1xi32> to vector<2x256xi32>
    %239 = arith.cmpi sge, %80, %238 : vector<2x256xi32>
    %240 = arith.extui %239 : vector<2x256xi1> to vector<2x256xi32>
    %241 = arith.sitofp %240 : vector<2x256xi32> to vector<2x256xf32>
    %cst_47 = arith.constant dense<0.000000e+00> : vector<2xf32>
    %242 = vector.multi_reduction <add>, %241, %cst_47 [1] : vector<2x256xf32> to vector<2xf32>
    %243 = vector.shape_cast %242 : vector<2xf32> to vector<2x1xf32>
    %244 = arith.cmpf oge, %243, %84 : vector<2x1xf32>
    %245 = arith.select %244, %237, %235 : vector<2x1xi1>, vector<2x1xi32>
    %c16384_i32 = arith.constant 16384 : i32
    %246 = vector.broadcast %c16384_i32 : i32 to vector<2x1xi32>
    %247 = arith.ori %245, %246 : vector<2x1xi32>
    %248 = vector.broadcast %247 : vector<2x1xi32> to vector<2x256xi32>
    %249 = arith.cmpi sge, %80, %248 : vector<2x256xi32>
    %250 = arith.extui %249 : vector<2x256xi1> to vector<2x256xi32>
    %251 = arith.sitofp %250 : vector<2x256xi32> to vector<2x256xf32>
    %cst_48 = arith.constant dense<0.000000e+00> : vector<2xf32>
    %252 = vector.multi_reduction <add>, %251, %cst_48 [1] : vector<2x256xf32> to vector<2xf32>
    %253 = vector.shape_cast %252 : vector<2xf32> to vector<2x1xf32>
    %254 = arith.cmpf oge, %253, %84 : vector<2x1xf32>
    %255 = arith.select %254, %247, %245 : vector<2x1xi1>, vector<2x1xi32>
    %c8192_i32 = arith.constant 8192 : i32
    %256 = vector.broadcast %c8192_i32 : i32 to vector<2x1xi32>
    %257 = arith.ori %255, %256 : vector<2x1xi32>
    %258 = vector.broadcast %257 : vector<2x1xi32> to vector<2x256xi32>
    %259 = arith.cmpi sge, %80, %258 : vector<2x256xi32>
    %260 = arith.extui %259 : vector<2x256xi1> to vector<2x256xi32>
    %261 = arith.sitofp %260 : vector<2x256xi32> to vector<2x256xf32>
    %cst_49 = arith.constant dense<0.000000e+00> : vector<2xf32>
    %262 = vector.multi_reduction <add>, %261, %cst_49 [1] : vector<2x256xf32> to vector<2xf32>
    %263 = vector.shape_cast %262 : vector<2xf32> to vector<2x1xf32>
    %264 = arith.cmpf oge, %263, %84 : vector<2x1xf32>
    %265 = arith.select %264, %257, %255 : vector<2x1xi1>, vector<2x1xi32>
    %c4096_i32 = arith.constant 4096 : i32
    %266 = vector.broadcast %c4096_i32 : i32 to vector<2x1xi32>
    %267 = arith.ori %265, %266 : vector<2x1xi32>
    %268 = vector.broadcast %267 : vector<2x1xi32> to vector<2x256xi32>
    %269 = arith.cmpi sge, %80, %268 : vector<2x256xi32>
    %270 = arith.extui %269 : vector<2x256xi1> to vector<2x256xi32>
    %271 = arith.sitofp %270 : vector<2x256xi32> to vector<2x256xf32>
    %cst_50 = arith.constant dense<0.000000e+00> : vector<2xf32>
    %272 = vector.multi_reduction <add>, %271, %cst_50 [1] : vector<2x256xf32> to vector<2xf32>
    %273 = vector.shape_cast %272 : vector<2xf32> to vector<2x1xf32>
    %274 = arith.cmpf oge, %273, %84 : vector<2x1xf32>
    %275 = arith.select %274, %267, %265 : vector<2x1xi1>, vector<2x1xi32>
    %c2048_i32 = arith.constant 2048 : i32
    %276 = vector.broadcast %c2048_i32 : i32 to vector<2x1xi32>
    %277 = arith.ori %275, %276 : vector<2x1xi32>
    %278 = vector.broadcast %277 : vector<2x1xi32> to vector<2x256xi32>
    %279 = arith.cmpi sge, %80, %278 : vector<2x256xi32>
    %280 = arith.extui %279 : vector<2x256xi1> to vector<2x256xi32>
    %281 = arith.sitofp %280 : vector<2x256xi32> to vector<2x256xf32>
    %cst_51 = arith.constant dense<0.000000e+00> : vector<2xf32>
    %282 = vector.multi_reduction <add>, %281, %cst_51 [1] : vector<2x256xf32> to vector<2xf32>
    %283 = vector.shape_cast %282 : vector<2xf32> to vector<2x1xf32>
    %284 = arith.cmpf oge, %283, %84 : vector<2x1xf32>
    %285 = arith.select %284, %277, %275 : vector<2x1xi1>, vector<2x1xi32>
    %c1024_i32 = arith.constant 1024 : i32
    %286 = vector.broadcast %c1024_i32 : i32 to vector<2x1xi32>
    %287 = arith.ori %285, %286 : vector<2x1xi32>
    %288 = vector.broadcast %287 : vector<2x1xi32> to vector<2x256xi32>
    %289 = arith.cmpi sge, %80, %288 : vector<2x256xi32>
    %290 = arith.extui %289 : vector<2x256xi1> to vector<2x256xi32>
    %291 = arith.sitofp %290 : vector<2x256xi32> to vector<2x256xf32>
    %cst_52 = arith.constant dense<0.000000e+00> : vector<2xf32>
    %292 = vector.multi_reduction <add>, %291, %cst_52 [1] : vector<2x256xf32> to vector<2xf32>
    %293 = vector.shape_cast %292 : vector<2xf32> to vector<2x1xf32>
    %294 = arith.cmpf oge, %293, %84 : vector<2x1xf32>
    %295 = arith.select %294, %287, %285 : vector<2x1xi1>, vector<2x1xi32>
    %c512_i32 = arith.constant 512 : i32
    %296 = vector.broadcast %c512_i32 : i32 to vector<2x1xi32>
    %297 = arith.ori %295, %296 : vector<2x1xi32>
    %298 = vector.broadcast %297 : vector<2x1xi32> to vector<2x256xi32>
    %299 = arith.cmpi sge, %80, %298 : vector<2x256xi32>
    %300 = arith.extui %299 : vector<2x256xi1> to vector<2x256xi32>
    %301 = arith.sitofp %300 : vector<2x256xi32> to vector<2x256xf32>
    %cst_53 = arith.constant dense<0.000000e+00> : vector<2xf32>
    %302 = vector.multi_reduction <add>, %301, %cst_53 [1] : vector<2x256xf32> to vector<2xf32>
    %303 = vector.shape_cast %302 : vector<2xf32> to vector<2x1xf32>
    %304 = arith.cmpf oge, %303, %84 : vector<2x1xf32>
    %305 = arith.select %304, %297, %295 : vector<2x1xi1>, vector<2x1xi32>
    %c256_i32 = arith.constant 256 : i32
    %306 = vector.broadcast %c256_i32 : i32 to vector<2x1xi32>
    %307 = arith.ori %305, %306 : vector<2x1xi32>
    %308 = vector.broadcast %307 : vector<2x1xi32> to vector<2x256xi32>
    %309 = arith.cmpi sge, %80, %308 : vector<2x256xi32>
    %310 = arith.extui %309 : vector<2x256xi1> to vector<2x256xi32>
    %311 = arith.sitofp %310 : vector<2x256xi32> to vector<2x256xf32>
    %cst_54 = arith.constant dense<0.000000e+00> : vector<2xf32>
    %312 = vector.multi_reduction <add>, %311, %cst_54 [1] : vector<2x256xf32> to vector<2xf32>
    %313 = vector.shape_cast %312 : vector<2xf32> to vector<2x1xf32>
    %314 = arith.cmpf oge, %313, %84 : vector<2x1xf32>
    %315 = arith.select %314, %307, %305 : vector<2x1xi1>, vector<2x1xi32>
    %c128_i32 = arith.constant 128 : i32
    %316 = vector.broadcast %c128_i32 : i32 to vector<2x1xi32>
    %317 = arith.ori %315, %316 : vector<2x1xi32>
    %318 = vector.broadcast %317 : vector<2x1xi32> to vector<2x256xi32>
    %319 = arith.cmpi sge, %80, %318 : vector<2x256xi32>
    %320 = arith.extui %319 : vector<2x256xi1> to vector<2x256xi32>
    %321 = arith.sitofp %320 : vector<2x256xi32> to vector<2x256xf32>
    %cst_55 = arith.constant dense<0.000000e+00> : vector<2xf32>
    %322 = vector.multi_reduction <add>, %321, %cst_55 [1] : vector<2x256xf32> to vector<2xf32>
    %323 = vector.shape_cast %322 : vector<2xf32> to vector<2x1xf32>
    %324 = arith.cmpf oge, %323, %84 : vector<2x1xf32>
    %325 = arith.select %324, %317, %315 : vector<2x1xi1>, vector<2x1xi32>
    %c64_i32 = arith.constant 64 : i32
    %326 = vector.broadcast %c64_i32 : i32 to vector<2x1xi32>
    %327 = arith.ori %325, %326 : vector<2x1xi32>
    %328 = vector.broadcast %327 : vector<2x1xi32> to vector<2x256xi32>
    %329 = arith.cmpi sge, %80, %328 : vector<2x256xi32>
    %330 = arith.extui %329 : vector<2x256xi1> to vector<2x256xi32>
    %331 = arith.sitofp %330 : vector<2x256xi32> to vector<2x256xf32>
    %cst_56 = arith.constant dense<0.000000e+00> : vector<2xf32>
    %332 = vector.multi_reduction <add>, %331, %cst_56 [1] : vector<2x256xf32> to vector<2xf32>
    %333 = vector.shape_cast %332 : vector<2xf32> to vector<2x1xf32>
    %334 = arith.cmpf oge, %333, %84 : vector<2x1xf32>
    %335 = arith.select %334, %327, %325 : vector<2x1xi1>, vector<2x1xi32>
    %c32_i32 = arith.constant 32 : i32
    %336 = vector.broadcast %c32_i32 : i32 to vector<2x1xi32>
    %337 = arith.ori %335, %336 : vector<2x1xi32>
    %338 = vector.broadcast %337 : vector<2x1xi32> to vector<2x256xi32>
    %339 = arith.cmpi sge, %80, %338 : vector<2x256xi32>
    %340 = arith.extui %339 : vector<2x256xi1> to vector<2x256xi32>
    %341 = arith.sitofp %340 : vector<2x256xi32> to vector<2x256xf32>
    %cst_57 = arith.constant dense<0.000000e+00> : vector<2xf32>
    %342 = vector.multi_reduction <add>, %341, %cst_57 [1] : vector<2x256xf32> to vector<2xf32>
    %343 = vector.shape_cast %342 : vector<2xf32> to vector<2x1xf32>
    %344 = arith.cmpf oge, %343, %84 : vector<2x1xf32>
    %345 = arith.select %344, %337, %335 : vector<2x1xi1>, vector<2x1xi32>
    %c16_i32 = arith.constant 16 : i32
    %346 = vector.broadcast %c16_i32 : i32 to vector<2x1xi32>
    %347 = arith.ori %345, %346 : vector<2x1xi32>
    %348 = vector.broadcast %347 : vector<2x1xi32> to vector<2x256xi32>
    %349 = arith.cmpi sge, %80, %348 : vector<2x256xi32>
    %350 = arith.extui %349 : vector<2x256xi1> to vector<2x256xi32>
    %351 = arith.sitofp %350 : vector<2x256xi32> to vector<2x256xf32>
    %cst_58 = arith.constant dense<0.000000e+00> : vector<2xf32>
    %352 = vector.multi_reduction <add>, %351, %cst_58 [1] : vector<2x256xf32> to vector<2xf32>
    %353 = vector.shape_cast %352 : vector<2xf32> to vector<2x1xf32>
    %354 = arith.cmpf oge, %353, %84 : vector<2x1xf32>
    %355 = arith.select %354, %347, %345 : vector<2x1xi1>, vector<2x1xi32>
    %c8_i32 = arith.constant 8 : i32
    %356 = vector.broadcast %c8_i32 : i32 to vector<2x1xi32>
    %357 = arith.ori %355, %356 : vector<2x1xi32>
    %358 = vector.broadcast %357 : vector<2x1xi32> to vector<2x256xi32>
    %359 = arith.cmpi sge, %80, %358 : vector<2x256xi32>
    %360 = arith.extui %359 : vector<2x256xi1> to vector<2x256xi32>
    %361 = arith.sitofp %360 : vector<2x256xi32> to vector<2x256xf32>
    %cst_59 = arith.constant dense<0.000000e+00> : vector<2xf32>
    %362 = vector.multi_reduction <add>, %361, %cst_59 [1] : vector<2x256xf32> to vector<2xf32>
    %363 = vector.shape_cast %362 : vector<2xf32> to vector<2x1xf32>
    %364 = arith.cmpf oge, %363, %84 : vector<2x1xf32>
    %365 = arith.select %364, %357, %355 : vector<2x1xi1>, vector<2x1xi32>
    %c4_i32 = arith.constant 4 : i32
    %366 = vector.broadcast %c4_i32 : i32 to vector<2x1xi32>
    %367 = arith.ori %365, %366 : vector<2x1xi32>
    %368 = vector.broadcast %367 : vector<2x1xi32> to vector<2x256xi32>
    %369 = arith.cmpi sge, %80, %368 : vector<2x256xi32>
    %370 = arith.extui %369 : vector<2x256xi1> to vector<2x256xi32>
    %371 = arith.sitofp %370 : vector<2x256xi32> to vector<2x256xf32>
    %cst_60 = arith.constant dense<0.000000e+00> : vector<2xf32>
    %372 = vector.multi_reduction <add>, %371, %cst_60 [1] : vector<2x256xf32> to vector<2xf32>
    %373 = vector.shape_cast %372 : vector<2xf32> to vector<2x1xf32>
    %374 = arith.cmpf oge, %373, %84 : vector<2x1xf32>
    %375 = arith.select %374, %367, %365 : vector<2x1xi1>, vector<2x1xi32>
    %c2_i32 = arith.constant 2 : i32
    %376 = vector.broadcast %c2_i32 : i32 to vector<2x1xi32>
    %377 = arith.ori %375, %376 : vector<2x1xi32>
    %378 = vector.broadcast %377 : vector<2x1xi32> to vector<2x256xi32>
    %379 = arith.cmpi sge, %80, %378 : vector<2x256xi32>
    %380 = arith.extui %379 : vector<2x256xi1> to vector<2x256xi32>
    %381 = arith.sitofp %380 : vector<2x256xi32> to vector<2x256xf32>
    %cst_61 = arith.constant dense<0.000000e+00> : vector<2xf32>
    %382 = vector.multi_reduction <add>, %381, %cst_61 [1] : vector<2x256xf32> to vector<2xf32>
    %383 = vector.shape_cast %382 : vector<2xf32> to vector<2x1xf32>
    %384 = arith.cmpf oge, %383, %84 : vector<2x1xf32>
    %385 = arith.select %384, %377, %375 : vector<2x1xi1>, vector<2x1xi32>
    %c1_i32 = arith.constant 1 : i32
    %386 = vector.broadcast %c1_i32 : i32 to vector<2x1xi32>
    %387 = arith.ori %385, %386 : vector<2x1xi32>
    %388 = vector.broadcast %387 : vector<2x1xi32> to vector<2x256xi32>
    %389 = arith.cmpi sge, %80, %388 : vector<2x256xi32>
    %390 = arith.extui %389 : vector<2x256xi1> to vector<2x256xi32>
    %391 = arith.sitofp %390 : vector<2x256xi32> to vector<2x256xf32>
    %cst_62 = arith.constant dense<0.000000e+00> : vector<2xf32>
    %392 = vector.multi_reduction <add>, %391, %cst_62 [1] : vector<2x256xf32> to vector<2xf32>
    %393 = vector.shape_cast %392 : vector<2xf32> to vector<2x1xf32>
    %394 = arith.cmpf oge, %393, %84 : vector<2x1xf32>
    %395 = arith.select %394, %387, %385 : vector<2x1xi1>, vector<2x1xi32>
    %396 = vector.broadcast %395 : vector<2x1xi32> to vector<2x256xi32>
    %397 = arith.cmpi sgt, %80, %396 : vector<2x256xi32>
    %398 = arith.extui %397 : vector<2x256xi1> to vector<2x256xi32>
    %399 = arith.sitofp %398 : vector<2x256xi32> to vector<2x256xf32>
    %cst_63 = arith.constant dense<0.000000e+00> : vector<2xf32>
    %400 = vector.multi_reduction <add>, %399, %cst_63 [1] : vector<2x256xf32> to vector<2xf32>
    %401 = vector.shape_cast %400 : vector<2xf32> to vector<2x1xf32>
    %402 = arith.mulf %79, %399 : vector<2x256xf32>
    %cst_64 = arith.constant dense<0.000000e+00> : vector<2xf32>
    %403 = vector.multi_reduction <add>, %402, %cst_64 [1] : vector<2x256xf32> to vector<2xf32>
    %404 = vector.shape_cast %403 : vector<2xf32> to vector<2x1xf32>
    %405 = vector.broadcast %395 : vector<2x1xi32> to vector<2x256xi32>
    %406 = arith.cmpi eq, %80, %405 : vector<2x256xi32>
    %cst_65 = arith.constant 0.000000e+00 : f32
    %407 = vector.broadcast %cst_65 : f32 to vector<2x256xf32>
    %408 = arith.select %406, %79, %407 : vector<2x256xi1>, vector<2x256xf32>
    %cst_66 = arith.constant dense<0xFF800000> : vector<2xf32>
    %409 = vector.multi_reduction <maximumf>, %408, %cst_66 [1] : vector<2x256xf32> to vector<2xf32>
    %410 = vector.shape_cast %409 : vector<2xf32> to vector<2x1xf32>
    %411 = arith.addf %75, %404 : vector<2x1xf32>
    %412 = arith.subf %84, %401 : vector<2x1xf32>
    %413 = arith.mulf %412, %410 : vector<2x1xf32>
    %414 = arith.addf %411, %413 : vector<2x1xf32>
    %415 = arith.addf %55, %414 : vector<2x1xf32>
    %cst_67 = arith.constant 0.000000e+00 : f32
    %416 = vector.broadcast %cst_67 : f32 to vector<2x1xf32>
    %417 = arith.cmpf ogt, %52, %416 : vector<2x1xf32>
    %418 = arith.extui %417 : vector<2x1xi1> to vector<2x1xi32>
    %419 = arith.sitofp %418 : vector<2x1xi32> to vector<2x1xf32>
    %cst_68 = arith.constant 9.99999997E-7 : f32
    %420 = vector.broadcast %cst_68 : f32 to vector<2x1xf32>
    %421 = arith.maximumf %52, %420 : vector<2x1xf32>
    %422 = arith.mulf %415, %419 : vector<2x1xf32>
    %423 = arith.divf %422, %421 : vector<2x1xf32>
    %424 = vector.shape_cast %423 : vector<2x1xf32> to vector<2x1xf32>
    %425 = vector.broadcast %424 : vector<2x1xf32> to vector<2x128xf32>
    %c0_69 = arith.constant 0 : index
    %c0_70 = arith.constant 0 : index
    %426 = vector.load %arg6[%c0_69, %c0_70] : memref<2x128xf32, #tpu.memory_space<vmem>>, vector<2x128xf32>
    tpu.vector_store %arg6[%c0_69, %c0_70], %425 {strides = array<i32>} : memref<2x128xf32, #tpu.memory_space<vmem>>, vector<2x128xf32>,
    return
  }
  func.func @transform_0(%arg0: i32) -> (i32, i32) {
    %c0_i32 = arith.constant 0 : i32
    %c0_i32_0 = arith.constant 0 : i32
    %c0_i32_1 = arith.constant 0 : i32
    return %c0_i32, %c0_i32_0 : i32, i32
  }
  func.func @transform_1(%arg0: i32) -> (i32, i32, i32) {
    %c0_i32 = arith.constant 0 : i32
    %c0_i32_0 = arith.constant 0 : i32
    %c0_i32_1 = arith.constant 0 : i32
    return %arg0, %c0_i32, %c0_i32_0 : i32, i32, i32
  }
  func.func @transform_2(%arg0: i32) -> (i32, i32, i32) {
    %c0_i32 = arith.constant 0 : i32
    %c0_i32_0 = arith.constant 0 : i32
    %c0_i32_1 = arith.constant 0 : i32
    return %arg0, %c0_i32, %c0_i32_0 : i32, i32, i32
  }
  func.func @transform_3(%arg0: i32) -> (i32, i32, i32) {
    %c0_i32 = arith.constant 0 : i32
    %c0_i32_0 = arith.constant 0 : i32
    %c0_i32_1 = arith.constant 0 : i32
    return %arg0, %c0_i32, %c0_i32_0 : i32, i32, i32
  }
  func.func @transform_4(%arg0: i32) -> (i32, i32) {
    %c0_i32 = arith.constant 0 : i32
    %c0_i32_0 = arith.constant 0 : i32
    return %arg0, %c0_i32 : i32, i32
  }
  func.func @transform_5(%arg0: i32) -> (i32, i32) {
    %c0_i32 = arith.constant 0 : i32
    %c0_i32_0 = arith.constant 0 : i32
    return %arg0, %c0_i32 : i32, i32
  }
}

</mosaic_0001>

<bundles_post_ra>
// kernel: tpu_custom_call.1
= control target key start
LH: loop header
LB: loop body
LE: loop exit
PB: predicated region body
PF: predicated region fallthrough
CT: control target
= control target key end

     0   :  { %10 = vsyncpa [#allocation3], 0  ;;  %s1724_s0 = inlined_call_operand.hbm [shape: f32[4,256], index: 0, kind: input, shape index: {}]   ;;  %s1725_s1 = inlined_call_operand.hbm [shape: f32[2,4,256], index: 1, kind: input, shape index: {}]   ;;  %s1726_s2 = inlined_call_operand.hbm [shape: f32[2,4,256], index: 2, kind: input, shape index: {}]   ;;  %s1727_s3 = inlined_call_operand.hbm [shape: f32[2,8,256], index: 3, kind: input, shape index: {}]   ;;  %s1728_s4 = inlined_call_operand.hbm [shape: s32[2,256], index: 4, kind: input, shape index: {}]   ;;  %s1729_s5 = inlined_call_operand.hbm [shape: f32[2,128], index: 5, kind: output, shape index: {}]  }
   0x1   :  { %11 = vsyncpa [#allocation6], 0 }
   0x2   :  { %12 = vsyncpa [#allocation9], 0  ;;  %s29_s20 = sshll.u32 %s1725_s1, 4  ;;  %s30_s20 = int_to_ptr.hbm [resolvable:$true] %s29_s20 }
   0x3   :  { %13 = vsyncpa [#allocation4], 0  ;;  %s1260_s21 = smov [#allocation5]   ;;  %s55_s25 = sshll.u32 %s1727_s3, 4  ;;  %s56_s25 = int_to_ptr.hbm [resolvable:$true] %s55_s25 }
   0x4   :  { %s31_s22 = sshll.u32 %s1260_s21, 4  ;;  %s1261_s26 = smov 128   ;;  %s32_s22 = int_to_ptr.vmem [resolvable:$true] %s31_s22 }
   0x5   :  { %s1262_s27 = smov 8   ;;  %s1263_s28 = smov [#allocation8]  }
   0x6   :  { %37 = dma.hbm_to_vmem [thread:$0]  %s30_s20, 256, %s32_s22, [#allocation6], %s1261_s26, %s1261_s26, %s1262_s27  }
   0x7   :  { %s57_s29 = sshll.u32 %s1263_s28, 4  ;;  %s1264_s30 = smov 256   ;;  %s58_s29 = int_to_ptr.vmem [resolvable:$true] %s57_s29 }
   0x8   :  { %s1265_s6 = smov 16   ;;  %s19_s8 = sshll.u32 %s1724_s0, 4  ;;  %s20_s8 = int_to_ptr.hbm [resolvable:$true] %s19_s8 }
   0x9   :  { %63 = dma.hbm_to_vmem [thread:$0]  %s56_s25, 512, %s58_s29, [#allocation9], %s1264_s30, %s1264_s30, %s1265_s6  }
   0xa   :  { %s1266_s9 = smov [#allocation2]   ;;  %s42_s12 = sshll.u32 %s1726_s2, 4  ;;  %s43_s12 = int_to_ptr.hbm [resolvable:$true] %s42_s12 }
   0xb   :  { %s21_s10 = sshll.u32 %s1266_s9, 4  ;;  %s1267_s13 = smov [#allocation7]   ;;  %s22_s10 = int_to_ptr.vmem [resolvable:$true] %s21_s10 }
   0xc   :  { %24 = dma.hbm_to_vmem [thread:$0]  %s20_s8, 128, %s22_s10, [#allocation3]  }
   0xd   :  { %s44_s14 = sshll.u32 %s1267_s13, 4  ;;  %s69_s17 = sshll.u32 %s1728_s4, 4  ;;  %s45_s14 = int_to_ptr.vmem [resolvable:$true] %s44_s14  ;;  %s70_s17 = int_to_ptr.hbm [resolvable:$true] %s69_s17 }
   0xe   :  { %50 = dma.hbm_to_vmem [thread:$0]  %s43_s12, 256, %s45_s14, [#allocation6], %s1261_s26, %s1261_s26, %s1262_s27  }
   0xf   :  { %s1268_s0 = smov [#allocation10]  }
  0x10   :  { %s71_s18 = sshll.u32 %s1268_s0, 4  ;;  %s72_s18 = int_to_ptr.vmem [resolvable:$true] %s71_s18 }
  0x11   :  { %74 = dma.hbm_to_vmem [thread:$0]  %s70_s17, 64, %s72_s18, [#allocation9]  }
  0x12   :  { %1252 = dma.done.wait [#allocation3], 128  }
  0x13   :  { %1253 = vsyncadd [#allocation3], 4294967168 }
  0x14   :  { %1254 = dma.done.wait [#allocation6], 512  }
  0x15   :  { %1255 = vsyncadd [#allocation6], 4294966784 }
  0x16   :  { %1256 = dma.done.wait [#allocation9], 576  }
  0x17   :  { %1257 = vsyncadd [#allocation9], 4294966720  ;;  %v95_v0 = vld [vmem:[#allocation2] sm:$0xff]  ;;  %v98_v1 = vld [vmem:[#allocation7] sm:$0xff]  ;;  %vm150_vm4 = vcmask 1041408   ;;  %vm270_vm6 = vcmask 1041409  }
  0x18   :  { %v99_v2 = vld [vmem:[#allocation7 + $0x8] sm:$0xff]  ;;  %v1317_v3 = vld [vmem:[#allocation8] sm:$0xff]  ;;  %v110_v4 = vrot.slane %v95_v0, 6  ;;  %v1319_v5 = vld [vmem:[#allocation8 + $0x8] sm:$0xff]  ;;  %v105_v8 = vsub.f32 %v98_v1, %v95_v0  ;;  %v115_v10 = vmul.f32 %v98_v1, %v95_v0  ;;  %vm272_vm7 = vcmask 1043459   ;;  %s1271_s2 = smov [#allocation11]  }
  0x19   :  { %v1321_v6 = vld [vmem:[#allocation8 + $0x10] sm:$0xff]  ;;  %v1323_v7 = vld [vmem:[#allocation8 + $0x18] sm:$0xff]  ;;  %v106_v9 = vsub.f32 %v99_v2, %v95_v0  ;;  %v116_v11 = vmul.f32 %v99_v2, %v95_v0  ;;  %v291_v13 = vrot.slane %v1317_v3, 4  ;;  %v297_v14 = vrot.slane %v1319_v5, 4  ;;  %v96_v19 = vld [vmem:[#allocation5] sm:$0xff]  ;;  %s986_s4 = sshll.u32 %s1271_s2, 4  ;;  %s987_s4 = int_to_ptr.vmem [resolvable:$true] %s986_s4 }
  0x1a   :  { %v111_v12 = vrot.slane %v110_v4, 4  ;;  %v303_v15 = vrot.slane %v1321_v6, 4  ;;  %v107_v16 = vmul.f32 10.0, %v105_v8  ;;  %1086 = vlog2.f32 %v115_v10  ;;  %v97_v20 = vld [vmem:[#allocation5 + $0x8] sm:$0xff]  ;;  %s988_s21 = sshll.u32 %s1729_s5, 4  ;;  %s989_s21 = int_to_ptr.hbm [resolvable:$true] %s988_s21 }
  0x1b   :  { %v108_v17 = vmul.f32 10.0, %v106_v9  ;;  %v309_v18 = vrot.slane %v1323_v7, 4  ;;  %1088 = vlog2.f32 %v116_v11  ;;  %v292_v21 = vmax.f32 %v1317_v3, %v291_v13 }
  0x1c   :  { %v298_v22 = vmax.f32 %v1319_v5, %v297_v14  ;;  %v304_v23 = vmax.f32 %v1321_v6, %v303_v15  ;;  %v113_v24 = vmul.f32 %v111_v12, %v107_v16  ;;  %v1357_v16 = vld [vmem:[#allocation10] sm:$0xf]  ;;  %vm264_vm8 = vcmask 1042434  }
  0x1d   :  { %v114_v25 = vmul.f32 %v111_v12, %v108_v17  ;;  %v293_v26 = vrot.slane %v292_v21, 2  ;;  %v310_v29 = vmax.f32 %v1323_v7, %v309_v18  ;;  %vm242_vm5 = vcmp.gt.s32.totalorder %v1357_v16, 0 }
  0x1e   :  { %v299_v27 = vrot.slane %v298_v22, 2  ;;  %v305_v28 = vrot.slane %v304_v23, 2  ;;  %v123_v30 = vsub.f32 %v96_v19, %v113_v24  ;;  %vm368_vm9 = vcmask 1040384  }
  0x1f   :  { %v124_v31 = vsub.f32 %v97_v20, %v114_v25  ;;  %v294_v32 = vmax.f32 %v292_v21, %v293_v26  ;;  %v311_v43 = vrot.slane %v310_v29, 2  ;;  %vm374_vm10 = vcmask 1042433  }
  0x20   :  { %v300_v33 = vmax.f32 %v298_v22, %v299_v27  ;;  %v1087_v34 = vpop.eup %1086  ;;  %v125_v35 = vand.u32 2147483647, %v123_v30  ;;  %v129_v37 = vmul.f32 0.5, %v123_v30  ;;  %v306_v42 = vmax.f32 %v304_v23, %v305_v28 }
  0x21   :  { %v126_v36 = vand.u32 2147483647, %v124_v31  ;;  %v130_v38 = vmul.f32 0.5, %v124_v31  ;;  %v1089_v39 = vpop.eup %1088  ;;  %v118_v40 = vmul.f32 0.6931472, %v1087_v34  ;;  %v295_v41 = vrot.slane %v294_v32, 1 }
  0x22   :  { %v120_v44 = vmul.f32 0.6931472, %v1089_v39  ;;  %vm127_vm0 = vcmp.lt.f32.partialorder %v125_v35, 1.0  ;;  %v131_v46 = vmul.f32 %v129_v37, %v123_v30  ;;  %v1000_v49 = vadd.f32 -0.5, %v125_v35 }
  0x23   :  { %vm1333_vm1 = vcmp.lt.f32.partialorder %v126_v36, 1.0  ;;  %v121_v47 = vmul.f32 5.0, %v118_v40  ;;  %v132_v48 = vmul.f32 %v130_v38, %v124_v31  ;;  %v1001_v50 = vadd.f32 -0.5, %v126_v36 }
  0x24   :  { %v122_v51 = vmul.f32 5.0, %v120_v44  ;;  %v1337_v52 = vmax.f32 %v294_v32, %v295_v41  ;;  %v301_v53 = vrot.slane %v300_v33, 1  ;;  %v135_v54 = vsel %vm127_vm0, %v131_v46, %v1000_v49 }
  0x25   :  { %v136_v55 = vsel %vm1333_vm1, %v132_v48, %v1001_v50  ;;  %v179_v56 = vsub.f32 %v96_v19, %v121_v47  ;;  %v307_v57 = vrot.slane %v306_v42, 1  ;;  %139 = vst [vmem:[#allocation1] ss:$2 sm:$0xff] %v135_v54  ;;  %v312_v59 = vmax.f32 %v310_v29, %v311_v43 }
  0x26   :  { %v180_v58 = vsub.f32 %v97_v20, %v122_v51  ;;  %143 = vst [vmem:[#allocation1 + $0x10] ss:$2 sm:$0xff] %v136_v55  ;;  %v315_v62 = vsub.f32 %v1317_v3, %v1337_v52  ;;  %v1343_v1 = vmax.f32 %v300_v33, %v301_v53  ;;  %v365_v29 = vrot.slane %v1357_v16, 1 }
  0x27   :  { %v181_v60 = vand.u32 2147483647, %v179_v56  ;;  %v185_v61 = vmul.f32 0.5, %v179_v56  ;;  %v313_v2 = vrot.slane %v312_v59, 1  ;;  %v1349_v10 = vmax.f32 %v306_v42, %v307_v57 }
  0x28   :  { %v182_v63 = vand.u32 2147483647, %v180_v58  ;;  %v186_v0 = vmul.f32 0.5, %v180_v58  ;;  %v319_v15 = vmul.f32 1.442695, %v315_v62  ;;  %v316_v18 = vsub.f32 %v1319_v5, %v1343_v1 }
  0x29   :  { %vm1345_vm2 = vcmp.lt.f32.partialorder %v181_v60, 1.0  ;;  %v187_v8 = vmul.f32 %v185_v61, %v179_v56  ;;  %v1002_v9 = vadd.f32 -0.5, %v181_v60  ;;  %v1355_v14 = vmax.f32 %v312_v59, %v313_v2 }
  0x2a   :  { %vm1351_vm3 = vcmp.lt.f32.partialorder %v182_v63, 1.0  ;;  %v188_v12 = vmul.f32 %v186_v0, %v180_v58  ;;  %v1003_v13 = vadd.f32 -0.5, %v182_v63  ;;  %v317_v22 = vsub.f32 %v1321_v6, %v1349_v10 }
  0x2b   :  { %v191_v17 = vsel %vm1345_vm2, %v187_v8, %v1002_v9  ;;  %v318_v23 = vsub.f32 %v1323_v7, %v1355_v14  ;;  %1090 = vpow2.f32 %v319_v15  ;;  %v321_v33 = vmul.f32 1.442695, %v316_v18 }
  0x2c   :  { %v1363_v19 = vld.sshfl [vmem:[#allocation1] sm:$0xff pattern:$0x75316420]  ;;  %v141_v20 = vld.sshfl [vmem:[#allocation1 + $0x8] sm:$0xff pattern:$0x75316420]  ;;  %v192_v21 = vsel %vm1351_vm3, %v188_v12, %v1003_v13  ;;  %v363_v51 = vlaneseq  ;;  %v372_v55 = vsel %vm270_vm6, %v1357_v16, %v365_v29  ;;  %v369_v60 = vsel %vm368_vm9, %v1357_v16, %v365_v29 }
  0x2d   :  { %v144_v24 = vld.sshfl [vmem:[#allocation1 + $0x10] sm:$0xff pattern:$0x75316420]  ;;  %v145_v25 = vld.sshfl [vmem:[#allocation1 + $0x18] sm:$0xff pattern:$0x75316420]  ;;  %1092 = vpow2.f32 %v321_v33 }
  0x2e   :  { %v158_v26 = vsel %vm150_vm4, %v141_v20, 0.0  ;;  %v165_v27 = vsel %vm150_vm4, %v144_v24, 0.0  ;;  %v172_v28 = vsel %vm150_vm4, %v145_v25, 0.0  ;;  %195 = vst [vmem:[#allocation1] ss:$2 sm:$0xff] %v191_v17  ;;  %v1269_v38 = vmov 0.0  }
  0x2f   :  { %v159_v30 = vrot.slane %v158_v26, 4  ;;  %v166_v31 = vrot.slane %v165_v27, 4  ;;  %v173_v32 = vrot.slane %v172_v28, 4  ;;  %199 = vst [vmem:[#allocation1 + $0x10] ss:$2 sm:$0xff] %v192_v21  ;;  %v1379_v39 = vsel %vm242_vm5, 1.0, %v1269_v38 }
  0x30   :  { %v323_v34 = vmul.f32 1.442695, %v317_v22  ;;  %v325_v35 = vmul.f32 1.442695, %v318_v23  ;;  %v366_v40 = vrot.slane %v1357_v16, 2  ;;  %v367_v43 = vrot.slane %v1357_v16, 3 }
  0x31   :  { %v160_v36 = vadd.f32 %v159_v30, %v158_v26  ;;  %v1091_v37 = vpop.eup %1090  ;;  %v167_v41 = vadd.f32 %v166_v31, %v165_v27  ;;  %v174_v42 = vadd.f32 %v173_v32, %v172_v28  ;;  %v364_v23 = vshrl.u32 %v363_v51, 7 }
  0x32   :  { %1094 = vpow2.f32 %v323_v34  ;;  %v327_v45 = vrot.slane %v1091_v37, 4  ;;  %v370_v0 = vsel %vm264_vm8, %v366_v40, %v367_v43  ;;  %v373_v2 = vsel %vm272_vm7, %v366_v40, %v367_v43 }
  0x33   :  { %v161_v44 = vrot.slane %v160_v36, 2  ;;  %1096 = vpow2.f32 %v325_v35  ;;  %v168_v53 = vrot.slane %v167_v41, 2  ;;  %v1093_v56 = vpop.eup %1092  ;;  %v175_v57 = vrot.slane %v174_v42, 2 }
  0x34   :  { %v328_v50 = vadd.f32 %v1091_v37, %v327_v45  ;;  %v333_v17 = vrot.slane %v1093_v56, 4  ;;  %v371_v31 = vsel %vm150_vm4, %v369_v60, %v370_v0  ;;  %v375_v32 = vsel %vm374_vm10, %v372_v55, %v373_v2 }
  0x35   :  { %v1383_v46 = vld.sshfl [vmem:[#allocation1] sm:$0xff pattern:$0x75316420]  ;;  %v197_v47 = vld.sshfl [vmem:[#allocation1 + $0x8] sm:$0xff pattern:$0x75316420]  ;;  %v1390_v62 = vadd.f32 %v161_v44, %v160_v36  ;;  %v169_v20 = vadd.f32 %v168_v53, %v167_v41  ;;  %v176_v28 = vadd.f32 %v175_v57, %v174_v42 }
  0x36   :  { %v200_v48 = vld.sshfl [vmem:[#allocation1 + $0x10] sm:$0xff pattern:$0x75316420]  ;;  %v201_v49 = vld.sshfl [vmem:[#allocation1 + $0x18] sm:$0xff pattern:$0x75316420]  ;;  %v334_v26 = vadd.f32 %v1093_v56, %v333_v17 }
  0x37   :  { %v203_v54 = vrot.slane %v197_v47, 2  ;;  %246 = vst [vmem:[#allocation1] ss:$4 sm:$0xff] %v1379_v39  ;;  %v204_v58 = vrot.slane %v200_v48, 2  ;;  %v205_v59 = vrot.slane %v201_v49, 2  ;;  %v329_v12 = vrot.slane %v328_v50, 2 }
  0x38   :  { %v1095_v61 = vpop.eup %1094  ;;  %v163_v33 = vrot.slane %v1390_v62, 1  ;;  %v335_v43 = vrot.slane %v334_v26, 2  ;;  %v376_v48 = vrot.slane %v375_v32, 1  ;;  %v170_v49 = vrot.slane %v169_v20, 1 }
  0x39   :  { %v217_v63 = vsel %vm150_vm4, %v203_v54, 0.0  ;;  %v1097_v4 = vpop.eup %1096  ;;  %v224_v9 = vsel %vm150_vm4, %v204_v58, 0.0  ;;  %v231_v11 = vsel %vm150_vm4, %v205_v59, 0.0  ;;  %v339_v18 = vrot.slane %v1095_v61, 4 }
  0x3a   :  { %v218_v8 = vrot.slane %v217_v63, 4  ;;  %v225_v13 = vrot.slane %v224_v9, 4  ;;  %v232_v15 = vrot.slane %v231_v11, 4  ;;  %v345_v22 = vrot.slane %v1097_v4, 4 }
  0x3b   :  { %v340_v27 = vadd.f32 %v1095_v61, %v339_v18  ;;  %v330_v37 = vadd.f32 %v329_v12, %v328_v50  ;;  %v336_v51 = vadd.f32 %v335_v43, %v334_v26  ;;  %v377_v54 = vperm.slane %v371_v31, 0 }
  0x3c   :  { %v219_v21 = vadd.f32 %v218_v8, %v217_v63  ;;  %v226_v24 = vadd.f32 %v225_v13, %v224_v9  ;;  %v233_v25 = vadd.f32 %v232_v15, %v231_v11  ;;  %v346_v30 = vadd.f32 %v1097_v4, %v345_v22 }
  0x3d   :  { %v341_v44 = vrot.slane %v340_v27, 2  ;;  %v331_v56 = vrot.slane %v330_v37, 1  ;;  %v378_v58 = vperm.slane %v371_v31, 1  ;;  %v337_v50 = vrot.slane %v336_v51, 1 }
  0x3e   :  { %v247_v29 = vld.sshfl [vmem:[#allocation1] sm:$0xff pattern:$0x73625140]  ;;  %v234_v34 = vrot.slane %v233_v25, 2  ;;  %v227_v40 = vrot.slane %v226_v24, 2  ;;  %v220_v45 = vrot.slane %v219_v21, 2  ;;  %v171_v8 = vadd.f32 %v170_v49, %v169_v20 }
  0x3f   :  { %v248_v35 = vld.sshfl [vmem:[#allocation1 + $0x8] sm:$0xff pattern:$0x73625140]  ;;  %v251_v36 = vsel %vm150_vm4, %v247_v29, 0.0  ;;  %v347_v47 = vrot.slane %v346_v30, 2  ;;  %v342_v53 = vadd.f32 %v341_v44, %v340_v27  ;;  %v379_v61 = vperm.slane %v376_v48, 0 }
  0x40   :  { %v252_v41 = vsel %vm150_vm4, %v248_v35, 0.0  ;;  %v235_v55 = vadd.f32 %v234_v34, %v233_v25  ;;  %v228_v59 = vadd.f32 %v227_v40, %v226_v24  ;;  %v177_v63 = vrot.slane %v176_v28, 1 }
  0x41   :  { %v253_v42 = vadd.f32 %v252_v41, %v251_v36  ;;  %v348_v57 = vadd.f32 %v347_v47, %v346_v30  ;;  %v343_v60 = vrot.slane %v342_v53, 1  ;;  %v221_v0 = vadd.f32 %v220_v45, %v219_v21 }
  0x42   :  { %v380_v4 = vperm.slane %v376_v48, 1  ;;  %v338_v9 = vadd.f32 %v337_v50, %v336_v51  ;;  %vm381_vm11 = vcmp.eq.s32.totalorder %v364_v23, %v377_v54  ;;  %v236_v12 = vrot.slane %v235_v55, 1 }
  0x43   :  { %254 = vadd.xlane.f32.xlu0 %v253_v42  ;;  %v349_v2 = vrot.slane %v348_v57, 1  ;;  %v344_v11 = vadd.f32 %v343_v60, %v342_v53  ;;  %v332_v13 = vadd.f32 %v331_v56, %v330_v37  ;;  %vm382_vm12 = vcmp.eq.s32.totalorder %v364_v23, %v378_v58 }
  0x44   :  { %v229_v17 = vrot.slane %v228_v59, 1  ;;  %1098 = vlog2.f32 %v338_v9  ;;  %vm383_vm13 = vcmp.eq.s32.totalorder %v364_v23, %v379_v61  ;;  %vm384_vm14 = vcmp.eq.s32.totalorder %v364_v23, %v380_v4 }
  0x45   :  { %v350_v15 = vadd.f32 %v349_v2, %v348_v57  ;;  %v178_v18 = vadd.f32 %v177_v63, %v176_v28  ;;  %v222_v22 = vrot.slane %v221_v0, 1  ;;  %1100 = vlog2.f32 %v344_v11 }
  0x46   :  { %v1005_v24 = vsel %vm381_vm11, 1.0, %v1269_v38  ;;  %v1006_v21 = vsel %vm382_vm12, 1.0, %v1269_v38  ;;  %v1007_v20 = vsel %vm383_vm13, 1.0, %v1269_v38  ;;  %v1008_v25 = vsel %vm384_vm14, 1.0, %v1269_v38 }
  0x47   :  { %1102 = vlog2.f32 %v350_v15  ;;  %v237_v26 = vadd.f32 %v236_v12, %v235_v55  ;;  %v393_v27 = vmul.f32 %v1005_v24, %v1317_v3  ;;  %v394_v29 = vmul.f32 %v1006_v21, %v1319_v5 }
  0x48   :  { %1104 = vlog2.f32 %v332_v13  ;;  %v230_v30 = vadd.f32 %v229_v17, %v228_v59  ;;  %v395_v23 = vmul.f32 %v1007_v20, %v1321_v6  ;;  %v396_v28 = vmul.f32 %v1008_v25, %v1323_v7 }
  0x49   :  { %v151_v31 = vsel %vm150_vm4, %v1363_v19, 0.0  ;;  %v397_v32 = vrot.slane %v393_v27, 4  ;;  %v403_v34 = vrot.slane %v394_v29, 4  ;;  %v202_v36 = vrot.slane %v1383_v46, 2 }
  0x4a   :  { %v152_v35 = vrot.slane %v151_v31, 4  ;;  %v1099_v37 = vpop.eup %1098  ;;  %v164_v3 = vadd.f32 %v163_v33, %v1390_v62  ;;  %v223_v40 = vadd.f32 %v222_v22, %v221_v0  ;;  %v409_v5 = vrot.slane %v395_v23, 4 }
  0x4b   :  { %v415_v41 = vrot.slane %v396_v28, 4  ;;  %v1101_v43 = vpop.eup %1100  ;;  %v241_v6 = vadd.f32 %v237_v26, %v178_v18  ;;  %v398_v44 = vadd.f32 %v397_v32, %v393_v27  ;;  %v404_v7 = vadd.f32 %v403_v34, %v394_v29 }
  0x4c   :  { %v153_v45 = vadd.f32 %v152_v35, %v151_v31  ;;  %v240_v19 = vadd.f32 %v230_v30, %v171_v8  ;;  %v410_v47 = vadd.f32 %v409_v5, %v395_v23  ;;  %v210_v49 = vsel %vm150_vm4, %v202_v36, 0.0 }
  0x4d   :  { %v1103_v42 = vpop.eup %1102  ;;  %v416_v48 = vadd.f32 %v415_v41, %v396_v28  ;;  %v354_v51 = vmul.f32 0.6931472, %v1099_v37  ;;  %v356_v53 = vmul.f32 0.6931472, %v1101_v43  ;;  %v399_v54 = vrot.slane %v398_v44, 2 }
  0x4e   :  { %v1105_v46 = vpop.eup %1104  ;;  %v405_v55 = vrot.slane %v404_v7, 2  ;;  %v358_v62 = vmul.f32 0.6931472, %v1103_v42  ;;  %v411_v33 = vrot.slane %v410_v47, 2  ;;  %v154_v57 = vrot.slane %v153_v45, 2 }
  0x4f   :  { %v417_v56 = vrot.slane %v416_v48, 2  ;;  %v261_v58 = vrot.slane %v241_v6, 6  ;;  %v400_v59 = vadd.f32 %v399_v54, %v398_v44  ;;  %v211_v60 = vrot.slane %v210_v49, 4 }
  0x50   :  { %v406_v50 = vadd.f32 %v405_v55, %v404_v7  ;;  %v352_v61 = vmul.f32 0.6931472, %v1105_v46  ;;  %v412_v63 = vadd.f32 %v411_v33, %v410_v47  ;;  %v155_v2 = vadd.f32 %v154_v57, %v153_v45 }
  0x51   :  { %v418_v0 = vadd.f32 %v417_v56, %v416_v48  ;;  %v360_v4 = vadd.f32 %v354_v51, %v1343_v1  ;;  %v361_v8 = vadd.f32 %v356_v53, %v1349_v10  ;;  %v212_v11 = vadd.f32 %v211_v60, %v210_v49 }
  0x52   :  { %v407_v9 = vrot.slane %v406_v50, 1  ;;  %v362_v12 = vadd.f32 %v358_v62, %v1355_v14  ;;  %v401_v13 = vrot.slane %v400_v59, 1  ;;  %v413_v15 = vrot.slane %v412_v63, 1 }
  0x53   :  { %v419_v17 = vrot.slane %v418_v0, 1  ;;  %v156_v22 = vrot.slane %v155_v2, 1  ;;  %v213_v24 = vrot.slane %v212_v11, 2  ;;  %v239_v25 = vadd.f32 %v223_v40, %v164_v3 }
  0x54   :  { %v408_v18 = vadd.f32 %v407_v9, %v406_v50  ;;  %v414_v21 = vadd.f32 %v413_v15, %v412_v63  ;;  %v263_v26 = vsel %vm150_vm4, %v240_v19, %v261_v58  ;;  %v359_v27 = vadd.f32 %v352_v61, %v1337_v52 }
  0x55   :  { %v420_v20 = vadd.f32 %v419_v17, %v418_v0  ;;  %v214_v1 = vadd.f32 %v213_v24, %v212_v11  ;;  %v402_v29 = vadd.f32 %v401_v13, %v400_v59  ;;  %v157_v23 = vadd.f32 %v156_v22, %v155_v2 }
  0x56   :  { %v1422_v10 = vsub.f32 %v360_v4, %v408_v18  ;;  %v1424_v30 = vsub.f32 %v361_v8, %v414_v21  ;;  %v260_v32 = vrot.slane %v239_v25, 6  ;;  %v269_v34 = vrot.slane %v263_v26, 7 }
  0x57   :  { %v1426_v14 = vsub.f32 %v362_v12, %v420_v20  ;;  %v215_v28 = vrot.slane %v214_v1, 1  ;;  %v1429_v36 = vsub.f32 %v359_v27, %v402_v29  ;;  %vm274_vm15 = vcmask 1045509  }
  0x58   :  { %v454_v37 = vmax.f32 %v1422_v10, 0.0  ;;  %v455_v52 = vmax.f32 %v1424_v30, 0.0  ;;  %vm276_vm0 = vcmask 1047559   ;;  %v1270_v4 = vmov 0  }
  0x59   :  { %v456_v31 = vmax.f32 %v1426_v14, 0.0  ;;  %v216_v35 = vadd.f32 %v215_v28, %v214_v1  ;;  %v453_v41 = vmax.f32 %v1429_v36, 0.0 }
  0x5a   :  { %v461_v43 = vrot.slane %v454_v37, 6 }
  0x5b   :  { %v462_v3 = vrot.slane %v456_v31, 6  ;;  %v238_v40 = vadd.f32 %v216_v35, %v157_v23 }
  0x5c   :  { %v463_v47 = vsel %vm150_vm4, %v453_v41, %v461_v43 }
  0x5d   :  { %v262_v5 = vsel %vm150_vm4, %v238_v40, %v260_v32  ;;  %v464_v6 = vsel %vm150_vm4, %v455_v52, %v462_v3 }
  0x5e   :  { %v271_v44 = vsel %vm270_vm6, %v269_v34, %v262_v5  ;;  %v467_v42 = vrot.slane %v464_v6, 7 }
  0x5f   :  { %v273_v7 = vsel %vm272_vm7, %v269_v34, %v271_v44 }
  0x60   :  { %v275_v45 = vsel %vm274_vm15, %v269_v34, %v273_v7  ;;  %v468_v49 = vsel %vm270_vm6, %v467_v42, %v463_v47 }
  0x61   :  { %v277_v19 = vsel %vm276_vm0, %v269_v34, %v275_v45  ;;  %v469_v46 = vsel %vm272_vm7, %v467_v42, %v468_v49 }
  0x62   :  { %v279_v48 = vmul.f32 %v1379_v39, %v277_v19  ;;  %v470_v51 = vsel %vm274_vm15, %v467_v42, %v469_v46 }
  0x63   :  { %v471_v55 = vsel %vm276_vm0, %v467_v42, %v470_v51 }
  0x64   :  { %281 = vst [vmem:[#allocation1] ss:$4 sm:$0xff] %v279_v48  ;;  %v1453_v62 = vsel %vm242_vm5, 0.0, %v471_v55 }
  0x6b   :  { %v1445_v53 = vld.sshfl [vmem:[#allocation1] sm:$0xff pattern:$0x73625140]  ;;  %v1447_v54 = vld.sshfl [vmem:[#allocation1 + $0x8] sm:$0xff pattern:$0x73625140] }
  0x6c   :  { %425 = vst [vmem:[#allocation1] ss:$4 sm:$0xff] %v1379_v39 }
  0x73   :  { %v1455_v33 = vld.sshfl [vmem:[#allocation1] sm:$0xff pattern:$0x73625140]  ;;  %v1457_v56 = vld.sshfl [vmem:[#allocation1 + $0x8] sm:$0xff pattern:$0x73625140] }
  0x74   :  { %475 = vst [vmem:[#allocation1] ss:$4 sm:$0xff] %v1453_v62 }
  0x7b   :  { %v1460_v57 = vld.sshfl [vmem:[#allocation1] sm:$0xff pattern:$0x73625140]  ;;  %v1462_v58 = vld.sshfl [vmem:[#allocation1 + $0x8] sm:$0xff pattern:$0x73625140] }
  0x7c   :  { %vm480_vm1 = vcmp.ge.s32.totalorder %v1460_v57, 1073741824  ;;  %vm481_vm2 = vcmp.ge.s32.totalorder %v1462_v58, 1073741824 }
  0x7d   :  { %v1009_v39 = vsel %vm480_vm1, 1.0, %v1269_v38  ;;  %v1010_v16 = vsel %vm481_vm2, 1.0, %v1269_v38 }
  0x7e   :  { %v486_v59 = vsel %vm150_vm4, %v1009_v39, 0.0  ;;  %v487_v50 = vsel %vm150_vm4, %v1010_v16, 0.0 }
  0x7f   :  { %v488_v60 = vadd.f32 %v487_v50, %v486_v59 }
  0x81   :  { %489 = vadd.xlane.f32.xlu0 %v488_v60 }
  0xb6   :  { %v1470_v61 = vpop.xlane.xlu0 %254 }
  0xb7   :  { %v478_v63 = vmul.f32 3.0, %v1470_v61 }
  0xb9   :  { %v1473_v0 = vmin.f32 %v478_v63, 256.0 }
  0xf4   :  { %v490_v2 = vpop.xlane.xlu0 %489 }
  0xf5   :  { %vm491_vm3 = vcmp.ge.f32.partialorder %v490_v2, %v1473_v0 }
  0xf6   :  { %v492_v8 = vsel %vm491_vm3, 1073741824, %v1270_v4 }
  0xf7   :  { %v493_v9 = vor.u32 536870912, %v492_v8 }
  0xf9   :  { %vm494_vm5 = vcmp.ge.s32.totalorder %v1460_v57, %v493_v9  ;;  %vm495_vm7 = vcmp.ge.s32.totalorder %v1462_v58, %v493_v9 }
  0xfa   :  { %v1011_v11 = vsel %vm494_vm5, 1.0, %v1269_v38  ;;  %v1012_v12 = vsel %vm495_vm7, 1.0, %v1269_v38 }
  0xfb   :  { %v500_v13 = vsel %vm150_vm4, %v1011_v11, 0.0  ;;  %v501_v15 = vsel %vm150_vm4, %v1012_v12, 0.0 }
  0xfc   :  { %v502_v17 = vadd.f32 %v501_v15, %v500_v13 }
  0xfe   :  { %503 = vadd.xlane.f32.xlu1 %v502_v17 }
 0x171   :  { %v504_v18 = vpop.xlane.xlu1 %503 }
 0x172   :  { %vm505_vm8 = vcmp.ge.f32.partialorder %v504_v18, %v1473_v0 }
 0x173   :  { %v506_v22 = vsel %vm505_vm8, %v493_v9, %v492_v8 }
 0x174   :  { %v507_v24 = vor.u32 268435456, %v506_v22 }
 0x176   :  { %vm508_vm9 = vcmp.ge.s32.totalorder %v1460_v57, %v507_v24  ;;  %vm509_vm10 = vcmp.ge.s32.totalorder %v1462_v58, %v507_v24 }
 0x177   :  { %v1013_v21 = vsel %vm508_vm9, 1.0, %v1269_v38  ;;  %v1014_v20 = vsel %vm509_vm10, 1.0, %v1269_v38 }
 0x178   :  { %v514_v25 = vsel %vm150_vm4, %v1013_v21, 0.0  ;;  %v515_v26 = vsel %vm150_vm4, %v1014_v20, 0.0 }
 0x179   :  { %v516_v27 = vadd.f32 %v515_v26, %v514_v25 }
 0x17b   :  { %517 = vadd.xlane.f32.xlu1 %v516_v27 }
 0x1ee   :  { %v518_v1 = vpop.xlane.xlu1 %517 }
 0x1ef   :  { %vm519_vm11 = vcmp.ge.f32.partialorder %v518_v1, %v1473_v0 }
 0x1f0   :  { %v520_v29 = vsel %vm519_vm11, %v507_v24, %v506_v22 }
 0x1f1   :  { %v521_v23 = vor.u32 134217728, %v520_v29 }
 0x1f3   :  { %vm522_vm12 = vcmp.ge.s32.totalorder %v1460_v57, %v521_v23  ;;  %vm523_vm13 = vcmp.ge.s32.totalorder %v1462_v58, %v521_v23 }
 0x1f4   :  { %v1015_v28 = vsel %vm522_vm12, 1.0, %v1269_v38  ;;  %v1016_v31 = vsel %vm523_vm13, 1.0, %v1269_v38 }
 0x1f5   :  { %v528_v32 = vsel %vm150_vm4, %v1015_v28, 0.0  ;;  %v529_v34 = vsel %vm150_vm4, %v1016_v31, 0.0 }
 0x1f6   :  { %v530_v35 = vadd.f32 %v529_v34, %v528_v32 }
 0x1f8   :  { %531 = vadd.xlane.f32.xlu2 %v530_v35 }
 0x26b   :  { %v532_v37 = vpop.xlane.xlu2 %531 }
 0x26c   :  { %vm533_vm14 = vcmp.ge.f32.partialorder %v532_v37, %v1473_v0 }
 0x26d   :  { %v534_v52 = vsel %vm533_vm14, %v521_v23, %v520_v29 }
 0x26e   :  { %v535_v3 = vor.u32 67108864, %v534_v52 }
 0x270   :  { %vm536_vm15 = vcmp.ge.s32.totalorder %v1460_v57, %v535_v3  ;;  %vm537_vm0 = vcmp.ge.s32.totalorder %v1462_v58, %v535_v3 }
 0x271   :  { %v1017_v40 = vsel %vm536_vm15, 1.0, %v1269_v38  ;;  %v1018_v5 = vsel %vm537_vm0, 1.0, %v1269_v38 }
 0x272   :  { %v542_v41 = vsel %vm150_vm4, %v1017_v40, 0.0  ;;  %v543_v43 = vsel %vm150_vm4, %v1018_v5, 0.0 }
 0x273   :  { %v544_v6 = vadd.f32 %v543_v43, %v542_v41 }
 0x275   :  { %545 = vadd.xlane.f32.xlu2 %v544_v6 }
 0x2e8   :  { %v546_v44 = vpop.xlane.xlu2 %545 }
 0x2e9   :  { %vm547_vm1 = vcmp.ge.f32.partialorder %v546_v44, %v1473_v0 }
 0x2ea   :  { %v548_v7 = vsel %vm547_vm1, %v535_v3, %v534_v52 }
 0x2eb   :  { %v549_v45 = vor.u32 33554432, %v548_v7 }
 0x2ed   :  { %vm550_vm2 = vcmp.ge.s32.totalorder %v1460_v57, %v549_v45  ;;  %vm551_vm3 = vcmp.ge.s32.totalorder %v1462_v58, %v549_v45 }
 0x2ee   :  { %v1019_v42 = vsel %vm550_vm2, 1.0, %v1269_v38  ;;  %v1020_v19 = vsel %vm551_vm3, 1.0, %v1269_v38 }
 0x2ef   :  { %v556_v47 = vsel %vm150_vm4, %v1019_v42, 0.0  ;;  %v557_v48 = vsel %vm150_vm4, %v1020_v19, 0.0 }
 0x2f0   :  { %v558_v49 = vadd.f32 %v557_v48, %v556_v47 }
 0x2f2   :  { %559 = vadd.xlane.f32.xlu0 %v558_v49 }
 0x365   :  { %v560_v46 = vpop.xlane.xlu0 %559 }
 0x366   :  { %vm561_vm5 = vcmp.ge.f32.partialorder %v560_v46, %v1473_v0 }
 0x367   :  { %v562_v51 = vsel %vm561_vm5, %v549_v45, %v548_v7 }
 0x368   :  { %v563_v55 = vor.u32 16777216, %v562_v51 }
 0x36a   :  { %vm564_vm7 = vcmp.ge.s32.totalorder %v1460_v57, %v563_v55  ;;  %vm565_vm8 = vcmp.ge.s32.totalorder %v1462_v58, %v563_v55 }
 0x36b   :  { %v1021_v39 = vsel %vm564_vm7, 1.0, %v1269_v38  ;;  %v1022_v16 = vsel %vm565_vm8, 1.0, %v1269_v38 }
 0x36c   :  { %v570_v59 = vsel %vm150_vm4, %v1021_v39, 0.0  ;;  %v571_v50 = vsel %vm150_vm4, %v1022_v16, 0.0 }
 0x36d   :  { %v572_v60 = vadd.f32 %v571_v50, %v570_v59 }
 0x36f   :  { %573 = vadd.xlane.f32.xlu1 %v572_v60 }
 0x3e2   :  { %v574_v63 = vpop.xlane.xlu1 %573 }
 0x3e3   :  { %vm575_vm9 = vcmp.ge.f32.partialorder %v574_v63, %v1473_v0 }
 0x3e4   :  { %v576_v2 = vsel %vm575_vm9, %v563_v55, %v562_v51 }
 0x3e5   :  { %v577_v4 = vor.u32 8388608, %v576_v2 }
 0x3e7   :  { %vm578_vm10 = vcmp.ge.s32.totalorder %v1460_v57, %v577_v4  ;;  %vm579_vm11 = vcmp.ge.s32.totalorder %v1462_v58, %v577_v4 }
 0x3e8   :  { %v1023_v8 = vsel %vm578_vm10, 1.0, %v1269_v38  ;;  %v1024_v9 = vsel %vm579_vm11, 1.0, %v1269_v38 }
 0x3e9   :  { %v584_v11 = vsel %vm150_vm4, %v1023_v8, 0.0  ;;  %v585_v12 = vsel %vm150_vm4, %v1024_v9, 0.0 }
 0x3ea   :  { %v586_v13 = vadd.f32 %v585_v12, %v584_v11 }
 0x3ec   :  { %587 = vadd.xlane.f32.xlu2 %v586_v13 }
 0x45f   :  { %v588_v15 = vpop.xlane.xlu2 %587 }
 0x460   :  { %vm589_vm12 = vcmp.ge.f32.partialorder %v588_v15, %v1473_v0 }
 0x461   :  { %v590_v17 = vsel %vm589_vm12, %v577_v4, %v576_v2 }
 0x462   :  { %v591_v18 = vor.u32 4194304, %v590_v17 }
 0x464   :  { %vm592_vm13 = vcmp.ge.s32.totalorder %v1460_v57, %v591_v18  ;;  %vm593_vm14 = vcmp.ge.s32.totalorder %v1462_v58, %v591_v18 }
 0x465   :  { %v1025_v22 = vsel %vm592_vm13, 1.0, %v1269_v38  ;;  %v1026_v24 = vsel %vm593_vm14, 1.0, %v1269_v38 }
 0x466   :  { %v598_v21 = vsel %vm150_vm4, %v1025_v22, 0.0  ;;  %v599_v20 = vsel %vm150_vm4, %v1026_v24, 0.0 }
 0x467   :  { %v600_v25 = vadd.f32 %v599_v20, %v598_v21 }
 0x469   :  { %601 = vadd.xlane.f32.xlu0 %v600_v25 }
 0x4dc   :  { %v602_v26 = vpop.xlane.xlu0 %601 }
 0x4dd   :  { %vm603_vm15 = vcmp.ge.f32.partialorder %v602_v26, %v1473_v0 }
 0x4de   :  { %v604_v27 = vsel %vm603_vm15, %v591_v18, %v590_v17 }
 0x4df   :  { %v605_v1 = vor.u32 2097152, %v604_v27 }
 0x4e1   :  { %vm606_vm0 = vcmp.ge.s32.totalorder %v1460_v57, %v605_v1  ;;  %vm607_vm1 = vcmp.ge.s32.totalorder %v1462_v58, %v605_v1 }
 0x4e2   :  { %v1027_v29 = vsel %vm606_vm0, 1.0, %v1269_v38  ;;  %v1028_v23 = vsel %vm607_vm1, 1.0, %v1269_v38 }
 0x4e3   :  { %v612_v28 = vsel %vm150_vm4, %v1027_v29, 0.0  ;;  %v613_v31 = vsel %vm150_vm4, %v1028_v23, 0.0 }
 0x4e4   :  { %v614_v32 = vadd.f32 %v613_v31, %v612_v28 }
 0x4e6   :  { %615 = vadd.xlane.f32.xlu1 %v614_v32 }
 0x559   :  { %v616_v34 = vpop.xlane.xlu1 %615 }
 0x55a   :  { %vm617_vm2 = vcmp.ge.f32.partialorder %v616_v34, %v1473_v0 }
 0x55b   :  { %v618_v35 = vsel %vm617_vm2, %v605_v1, %v604_v27 }
 0x55c   :  { %v619_v37 = vor.u32 1048576, %v618_v35 }
 0x55e   :  { %vm620_vm3 = vcmp.ge.s32.totalorder %v1460_v57, %v619_v37  ;;  %vm621_vm5 = vcmp.ge.s32.totalorder %v1462_v58, %v619_v37 }
 0x55f   :  { %v1029_v52 = vsel %vm620_vm3, 1.0, %v1269_v38  ;;  %v1030_v3 = vsel %vm621_vm5, 1.0, %v1269_v38 }
 0x560   :  { %v626_v40 = vsel %vm150_vm4, %v1029_v52, 0.0  ;;  %v627_v5 = vsel %vm150_vm4, %v1030_v3, 0.0 }
 0x561   :  { %v628_v41 = vadd.f32 %v627_v5, %v626_v40 }
 0x563   :  { %629 = vadd.xlane.f32.xlu2 %v628_v41 }
 0x5d6   :  { %v630_v43 = vpop.xlane.xlu2 %629 }
 0x5d7   :  { %vm631_vm7 = vcmp.ge.f32.partialorder %v630_v43, %v1473_v0 }
 0x5d8   :  { %v632_v6 = vsel %vm631_vm7, %v619_v37, %v618_v35 }
 0x5d9   :  { %v633_v44 = vor.u32 524288, %v632_v6 }
 0x5db   :  { %vm634_vm8 = vcmp.ge.s32.totalorder %v1460_v57, %v633_v44  ;;  %vm635_vm9 = vcmp.ge.s32.totalorder %v1462_v58, %v633_v44 }
 0x5dc   :  { %v1031_v7 = vsel %vm634_vm8, 1.0, %v1269_v38  ;;  %v1032_v45 = vsel %vm635_vm9, 1.0, %v1269_v38 }
 0x5dd   :  { %v640_v42 = vsel %vm150_vm4, %v1031_v7, 0.0  ;;  %v641_v19 = vsel %vm150_vm4, %v1032_v45, 0.0 }
 0x5de   :  { %v642_v47 = vadd.f32 %v641_v19, %v640_v42 }
 0x5e0   :  { %643 = vadd.xlane.f32.xlu0 %v642_v47 }
 0x653   :  { %v644_v48 = vpop.xlane.xlu0 %643 }
 0x654   :  { %vm645_vm10 = vcmp.ge.f32.partialorder %v644_v48, %v1473_v0 }
 0x655   :  { %v646_v49 = vsel %vm645_vm10, %v633_v44, %v632_v6 }
 0x656   :  { %v647_v46 = vor.u32 262144, %v646_v49 }
 0x658   :  { %vm648_vm11 = vcmp.ge.s32.totalorder %v1460_v57, %v647_v46  ;;  %vm649_vm12 = vcmp.ge.s32.totalorder %v1462_v58, %v647_v46 }
 0x659   :  { %v1033_v51 = vsel %vm648_vm11, 1.0, %v1269_v38  ;;  %v1034_v55 = vsel %vm649_vm12, 1.0, %v1269_v38 }
 0x65a   :  { %v654_v39 = vsel %vm150_vm4, %v1033_v51, 0.0  ;;  %v655_v16 = vsel %vm150_vm4, %v1034_v55, 0.0 }
 0x65b   :  { %v656_v59 = vadd.f32 %v655_v16, %v654_v39 }
 0x65d   :  { %657 = vadd.xlane.f32.xlu1 %v656_v59 }
 0x6d0   :  { %v658_v50 = vpop.xlane.xlu1 %657 }
 0x6d1   :  { %vm659_vm13 = vcmp.ge.f32.partialorder %v658_v50, %v1473_v0 }
 0x6d2   :  { %v660_v60 = vsel %vm659_vm13, %v647_v46, %v646_v49 }
 0x6d3   :  { %v661_v63 = vor.u32 131072, %v660_v60 }
 0x6d5   :  { %vm662_vm14 = vcmp.ge.s32.totalorder %v1460_v57, %v661_v63  ;;  %vm663_vm15 = vcmp.ge.s32.totalorder %v1462_v58, %v661_v63 }
 0x6d6   :  { %v1035_v2 = vsel %vm662_vm14, 1.0, %v1269_v38  ;;  %v1036_v4 = vsel %vm663_vm15, 1.0, %v1269_v38 }
 0x6d7   :  { %v668_v8 = vsel %vm150_vm4, %v1035_v2, 0.0  ;;  %v669_v9 = vsel %vm150_vm4, %v1036_v4, 0.0 }
 0x6d8   :  { %v670_v11 = vadd.f32 %v669_v9, %v668_v8 }
 0x6da   :  { %671 = vadd.xlane.f32.xlu2 %v670_v11 }
 0x74d   :  { %v672_v12 = vpop.xlane.xlu2 %671 }
 0x74e   :  { %vm673_vm0 = vcmp.ge.f32.partialorder %v672_v12, %v1473_v0 }
 0x74f   :  { %v674_v13 = vsel %vm673_vm0, %v661_v63, %v660_v60 }
 0x750   :  { %v675_v15 = vor.u32 65536, %v674_v13 }
 0x752   :  { %vm676_vm1 = vcmp.ge.s32.totalorder %v1460_v57, %v675_v15  ;;  %vm677_vm2 = vcmp.ge.s32.totalorder %v1462_v58, %v675_v15 }
 0x753   :  { %v1037_v17 = vsel %vm676_vm1, 1.0, %v1269_v38  ;;  %v1038_v18 = vsel %vm677_vm2, 1.0, %v1269_v38 }
 0x754   :  { %v682_v22 = vsel %vm150_vm4, %v1037_v17, 0.0  ;;  %v683_v24 = vsel %vm150_vm4, %v1038_v18, 0.0 }
 0x755   :  { %v684_v21 = vadd.f32 %v683_v24, %v682_v22 }
 0x757   :  { %685 = vadd.xlane.f32.xlu0 %v684_v21 }
 0x7ca   :  { %v686_v20 = vpop.xlane.xlu0 %685 }
 0x7cb   :  { %vm687_vm3 = vcmp.ge.f32.partialorder %v686_v20, %v1473_v0 }
 0x7cc   :  { %v688_v25 = vsel %vm687_vm3, %v675_v15, %v674_v13 }
 0x7cd   :  { %v689_v26 = vor.u32 32768, %v688_v25 }
 0x7cf   :  { %vm690_vm5 = vcmp.ge.s32.totalorder %v1460_v57, %v689_v26  ;;  %vm691_vm7 = vcmp.ge.s32.totalorder %v1462_v58, %v689_v26 }
 0x7d0   :  { %v1039_v27 = vsel %vm690_vm5, 1.0, %v1269_v38  ;;  %v1040_v1 = vsel %vm691_vm7, 1.0, %v1269_v38 }
 0x7d1   :  { %v696_v29 = vsel %vm150_vm4, %v1039_v27, 0.0  ;;  %v697_v23 = vsel %vm150_vm4, %v1040_v1, 0.0 }
 0x7d2   :  { %v698_v28 = vadd.f32 %v697_v23, %v696_v29 }
 0x7d4   :  { %699 = vadd.xlane.f32.xlu1 %v698_v28 }
 0x847   :  { %v700_v31 = vpop.xlane.xlu1 %699 }
 0x848   :  { %vm701_vm8 = vcmp.ge.f32.partialorder %v700_v31, %v1473_v0 }
 0x849   :  { %v702_v32 = vsel %vm701_vm8, %v689_v26, %v688_v25 }
 0x84a   :  { %v703_v34 = vor.u32 16384, %v702_v32 }
 0x84c   :  { %vm704_vm9 = vcmp.ge.s32.totalorder %v1460_v57, %v703_v34  ;;  %vm705_vm10 = vcmp.ge.s32.totalorder %v1462_v58, %v703_v34 }
 0x84d   :  { %v1041_v35 = vsel %vm704_vm9, 1.0, %v1269_v38  ;;  %v1042_v37 = vsel %vm705_vm10, 1.0, %v1269_v38 }
 0x84e   :  { %v710_v52 = vsel %vm150_vm4, %v1041_v35, 0.0  ;;  %v711_v3 = vsel %vm150_vm4, %v1042_v37, 0.0 }
 0x84f   :  { %v712_v40 = vadd.f32 %v711_v3, %v710_v52 }
 0x851   :  { %713 = vadd.xlane.f32.xlu2 %v712_v40 }
 0x8c4   :  { %v714_v5 = vpop.xlane.xlu2 %713 }
 0x8c5   :  { %vm715_vm11 = vcmp.ge.f32.partialorder %v714_v5, %v1473_v0 }
 0x8c6   :  { %v716_v41 = vsel %vm715_vm11, %v703_v34, %v702_v32 }
 0x8c7   :  { %v717_v43 = vor.u32 8192, %v716_v41 }
 0x8c9   :  { %vm718_vm12 = vcmp.ge.s32.totalorder %v1460_v57, %v717_v43  ;;  %vm719_vm13 = vcmp.ge.s32.totalorder %v1462_v58, %v717_v43 }
 0x8ca   :  { %v1043_v6 = vsel %vm718_vm12, 1.0, %v1269_v38  ;;  %v1044_v44 = vsel %vm719_vm13, 1.0, %v1269_v38 }
 0x8cb   :  { %v724_v7 = vsel %vm150_vm4, %v1043_v6, 0.0  ;;  %v725_v45 = vsel %vm150_vm4, %v1044_v44, 0.0 }
 0x8cc   :  { %v726_v42 = vadd.f32 %v725_v45, %v724_v7 }
 0x8ce   :  { %727 = vadd.xlane.f32.xlu0 %v726_v42 }
 0x941   :  { %v728_v19 = vpop.xlane.xlu0 %727 }
 0x942   :  { %vm729_vm14 = vcmp.ge.f32.partialorder %v728_v19, %v1473_v0 }
 0x943   :  { %v730_v47 = vsel %vm729_vm14, %v717_v43, %v716_v41 }
 0x944   :  { %v731_v48 = vor.u32 4096, %v730_v47 }
 0x946   :  { %vm732_vm15 = vcmp.ge.s32.totalorder %v1460_v57, %v731_v48  ;;  %vm733_vm0 = vcmp.ge.s32.totalorder %v1462_v58, %v731_v48 }
 0x947   :  { %v1045_v49 = vsel %vm732_vm15, 1.0, %v1269_v38  ;;  %v1046_v46 = vsel %vm733_vm0, 1.0, %v1269_v38 }
 0x948   :  { %v738_v51 = vsel %vm150_vm4, %v1045_v49, 0.0  ;;  %v739_v55 = vsel %vm150_vm4, %v1046_v46, 0.0 }
 0x949   :  { %v740_v39 = vadd.f32 %v739_v55, %v738_v51 }
 0x94b   :  { %741 = vadd.xlane.f32.xlu1 %v740_v39 }
 0x9be   :  { %v742_v16 = vpop.xlane.xlu1 %741 }
 0x9bf   :  { %vm743_vm1 = vcmp.ge.f32.partialorder %v742_v16, %v1473_v0 }
 0x9c0   :  { %v744_v59 = vsel %vm743_vm1, %v731_v48, %v730_v47 }
 0x9c1   :  { %v745_v50 = vor.u32 2048, %v744_v59 }
 0x9c3   :  { %vm746_vm2 = vcmp.ge.s32.totalorder %v1460_v57, %v745_v50  ;;  %vm747_vm3 = vcmp.ge.s32.totalorder %v1462_v58, %v745_v50 }
 0x9c4   :  { %v1047_v60 = vsel %vm746_vm2, 1.0, %v1269_v38  ;;  %v1048_v63 = vsel %vm747_vm3, 1.0, %v1269_v38 }
 0x9c5   :  { %v752_v2 = vsel %vm150_vm4, %v1047_v60, 0.0  ;;  %v753_v4 = vsel %vm150_vm4, %v1048_v63, 0.0 }
 0x9c6   :  { %v754_v8 = vadd.f32 %v753_v4, %v752_v2 }
 0x9c8   :  { %755 = vadd.xlane.f32.xlu2 %v754_v8 }
 0xa3b   :  { %v756_v9 = vpop.xlane.xlu2 %755 }
 0xa3c   :  { %vm757_vm5 = vcmp.ge.f32.partialorder %v756_v9, %v1473_v0 }
 0xa3d   :  { %v758_v11 = vsel %vm757_vm5, %v745_v50, %v744_v59 }
 0xa3e   :  { %v759_v12 = vor.u32 1024, %v758_v11 }
 0xa40   :  { %vm760_vm7 = vcmp.ge.s32.totalorder %v1460_v57, %v759_v12  ;;  %vm761_vm8 = vcmp.ge.s32.totalorder %v1462_v58, %v759_v12 }
 0xa41   :  { %v1049_v13 = vsel %vm760_vm7, 1.0, %v1269_v38  ;;  %v1050_v15 = vsel %vm761_vm8, 1.0, %v1269_v38 }
 0xa42   :  { %v766_v17 = vsel %vm150_vm4, %v1049_v13, 0.0  ;;  %v767_v18 = vsel %vm150_vm4, %v1050_v15, 0.0 }
 0xa43   :  { %v768_v22 = vadd.f32 %v767_v18, %v766_v17 }
 0xa45   :  { %769 = vadd.xlane.f32.xlu0 %v768_v22 }
 0xab8   :  { %v770_v24 = vpop.xlane.xlu0 %769 }
 0xab9   :  { %vm771_vm9 = vcmp.ge.f32.partialorder %v770_v24, %v1473_v0 }
 0xaba   :  { %v772_v21 = vsel %vm771_vm9, %v759_v12, %v758_v11 }
 0xabb   :  { %v773_v20 = vor.u32 512, %v772_v21 }
 0xabd   :  { %vm774_vm10 = vcmp.ge.s32.totalorder %v1460_v57, %v773_v20  ;;  %vm775_vm11 = vcmp.ge.s32.totalorder %v1462_v58, %v773_v20 }
 0xabe   :  { %v1051_v25 = vsel %vm774_vm10, 1.0, %v1269_v38  ;;  %v1052_v26 = vsel %vm775_vm11, 1.0, %v1269_v38 }
 0xabf   :  { %v780_v27 = vsel %vm150_vm4, %v1051_v25, 0.0  ;;  %v781_v1 = vsel %vm150_vm4, %v1052_v26, 0.0 }
 0xac0   :  { %v782_v29 = vadd.f32 %v781_v1, %v780_v27 }
 0xac2   :  { %783 = vadd.xlane.f32.xlu1 %v782_v29 }
 0xb35   :  { %v784_v23 = vpop.xlane.xlu1 %783 }
 0xb36   :  { %vm785_vm12 = vcmp.ge.f32.partialorder %v784_v23, %v1473_v0 }
 0xb37   :  { %v786_v28 = vsel %vm785_vm12, %v773_v20, %v772_v21 }
 0xb38   :  { %v787_v31 = vor.u32 256, %v786_v28 }
 0xb3a   :  { %vm788_vm13 = vcmp.ge.s32.totalorder %v1460_v57, %v787_v31  ;;  %vm789_vm14 = vcmp.ge.s32.totalorder %v1462_v58, %v787_v31 }
 0xb3b   :  { %v1053_v32 = vsel %vm788_vm13, 1.0, %v1269_v38  ;;  %v1054_v34 = vsel %vm789_vm14, 1.0, %v1269_v38 }
 0xb3c   :  { %v794_v35 = vsel %vm150_vm4, %v1053_v32, 0.0  ;;  %v795_v37 = vsel %vm150_vm4, %v1054_v34, 0.0 }
 0xb3d   :  { %v796_v52 = vadd.f32 %v795_v37, %v794_v35 }
 0xb3f   :  { %797 = vadd.xlane.f32.xlu2 %v796_v52 }
 0xbb2   :  { %v798_v3 = vpop.xlane.xlu2 %797 }
 0xbb3   :  { %vm799_vm15 = vcmp.ge.f32.partialorder %v798_v3, %v1473_v0 }
 0xbb4   :  { %v800_v40 = vsel %vm799_vm15, %v787_v31, %v786_v28 }
 0xbb5   :  { %v801_v5 = vor.u32 128, %v800_v40 }
 0xbb7   :  { %vm802_vm0 = vcmp.ge.s32.totalorder %v1460_v57, %v801_v5  ;;  %vm803_vm1 = vcmp.ge.s32.totalorder %v1462_v58, %v801_v5 }
 0xbb8   :  { %v1055_v41 = vsel %vm802_vm0, 1.0, %v1269_v38  ;;  %v1056_v43 = vsel %vm803_vm1, 1.0, %v1269_v38 }
 0xbb9   :  { %v808_v6 = vsel %vm150_vm4, %v1055_v41, 0.0  ;;  %v809_v44 = vsel %vm150_vm4, %v1056_v43, 0.0 }
 0xbba   :  { %v810_v7 = vadd.f32 %v809_v44, %v808_v6 }
 0xbbc   :  { %811 = vadd.xlane.f32.xlu0 %v810_v7 }
 0xc2f   :  { %v812_v45 = vpop.xlane.xlu0 %811 }
 0xc30   :  { %vm813_vm2 = vcmp.ge.f32.partialorder %v812_v45, %v1473_v0 }
 0xc31   :  { %v814_v42 = vsel %vm813_vm2, %v801_v5, %v800_v40 }
 0xc32   :  { %v815_v19 = vor.u32 64, %v814_v42 }
 0xc34   :  { %vm816_vm3 = vcmp.ge.s32.totalorder %v1460_v57, %v815_v19  ;;  %vm817_vm5 = vcmp.ge.s32.totalorder %v1462_v58, %v815_v19 }
 0xc35   :  { %v1057_v47 = vsel %vm816_vm3, 1.0, %v1269_v38  ;;  %v1058_v48 = vsel %vm817_vm5, 1.0, %v1269_v38 }
 0xc36   :  { %v822_v49 = vsel %vm150_vm4, %v1057_v47, 0.0  ;;  %v823_v46 = vsel %vm150_vm4, %v1058_v48, 0.0 }
 0xc37   :  { %v824_v51 = vadd.f32 %v823_v46, %v822_v49  ;;  %v428_v46 = vrot.slane %v1455_v33, 1 }
 0xc39   :  { %825 = vadd.xlane.f32.xlu1 %v824_v51  ;;  %v429_v51 = vrot.slane %v1457_v56, 1 }
 0xcac   :  { %v826_v55 = vpop.xlane.xlu1 %825 }
 0xcad   :  { %vm827_vm7 = vcmp.ge.f32.partialorder %v826_v55, %v1473_v0  ;;  %v436_v55 = vmul.f32 %v428_v46, %v1424_v30  ;;  %v286_v30 = vsel %vm150_vm4, %v1445_v53, 0.0 }
 0xcae   :  { %v828_v39 = vsel %vm827_vm7, %v815_v19, %v814_v42 }
 0xcaf   :  { %v829_v16 = vor.u32 32, %v828_v39 }
 0xcb1   :  { %vm830_vm8 = vcmp.ge.s32.totalorder %v1460_v57, %v829_v16  ;;  %vm831_vm9 = vcmp.ge.s32.totalorder %v1462_v58, %v829_v16 }
 0xcb2   :  { %v1059_v59 = vsel %vm830_vm8, 1.0, %v1269_v38  ;;  %v1060_v50 = vsel %vm831_vm9, 1.0, %v1269_v38 }
 0xcb3   :  { %v836_v60 = vsel %vm150_vm4, %v1059_v59, 0.0  ;;  %v837_v63 = vsel %vm150_vm4, %v1060_v50, 0.0  ;;  %v435_v59 = vmul.f32 %v1457_v56, %v1422_v10  ;;  %v442_v50 = vrot.slane %v436_v55, 7 }
 0xcb4   :  { %v838_v2 = vadd.f32 %v837_v63, %v836_v60 }
 0xcb6   :  { %839 = vadd.xlane.f32.xlu2 %v838_v2 }
 0xd29   :  { %v840_v4 = vpop.xlane.xlu2 %839 }
 0xd2a   :  { %vm841_vm10 = vcmp.ge.f32.partialorder %v840_v4, %v1473_v0 }
 0xd2b   :  { %v842_v8 = vsel %vm841_vm10, %v829_v16, %v828_v39  ;;  %v437_v39 = vmul.f32 %v429_v51, %v1426_v14  ;;  %v434_v16 = vmul.f32 %v1455_v33, %v1429_v36  ;;  %v287_v14 = vsel %vm150_vm4, %v1447_v54, 0.0 }
 0xd2c   :  { %v843_v9 = vor.u32 16, %v842_v8  ;;  %v288_v36 = vadd.f32 %v287_v14, %v286_v30 }
 0xd2d   :  { %v444_v60 = vrot.slane %v437_v39, 7  ;;  %v443_v63 = vsel %vm270_vm6, %v442_v50, %v434_v16 }
 0xd2e   :  { %vm844_vm11 = vcmp.ge.s32.totalorder %v1460_v57, %v843_v9  ;;  %vm845_vm12 = vcmp.ge.s32.totalorder %v1462_v58, %v843_v9  ;;  %v448_v4 = vsel %vm150_vm4, %v443_v63, 0.0 }
 0xd2f   :  { %v1061_v11 = vsel %vm844_vm11, 1.0, %v1269_v38  ;;  %v1062_v12 = vsel %vm845_vm12, 1.0, %v1269_v38  ;;  %v445_v2 = vsel %vm270_vm6, %v444_v60, %v435_v59 }
 0xd30   :  { %v850_v13 = vsel %vm150_vm4, %v1061_v11, 0.0  ;;  %v851_v15 = vsel %vm150_vm4, %v1062_v12, 0.0 }
 0xd31   :  { %v852_v17 = vadd.f32 %v851_v15, %v850_v13 }
 0xd33   :  { %853 = vadd.xlane.f32.xlu0 %v852_v17 }
 0xda6   :  { %v854_v18 = vpop.xlane.xlu0 %853 }
 0xda7   :  { %vm855_vm13 = vcmp.ge.f32.partialorder %v854_v18, %v1473_v0 }
 0xda8   :  { %v856_v22 = vsel %vm855_vm13, %v843_v9, %v842_v8  ;;  %v449_v8 = vsel %vm150_vm4, %v445_v2, 0.0 }
 0xda9   :  { %v857_v24 = vor.u32 8, %v856_v22  ;;  %v450_v9 = vadd.f32 %v449_v8, %v448_v4 }
 0xdab   :  { %vm858_vm14 = vcmp.ge.s32.totalorder %v1460_v57, %v857_v24  ;;  %vm859_vm15 = vcmp.ge.s32.totalorder %v1462_v58, %v857_v24 }
 0xdac   :  { %v1063_v21 = vsel %vm858_vm14, 1.0, %v1269_v38  ;;  %v1064_v20 = vsel %vm859_vm15, 1.0, %v1269_v38 }
 0xdad   :  { %v864_v25 = vsel %vm150_vm4, %v1063_v21, 0.0  ;;  %v865_v26 = vsel %vm150_vm4, %v1064_v20, 0.0 }
 0xdae   :  { %v866_v27 = vadd.f32 %v865_v26, %v864_v25 }
 0xdb0   :  { %867 = vadd.xlane.f32.xlu1 %v866_v27 }
 0xe23   :  { %v868_v1 = vpop.xlane.xlu1 %867 }
 0xe24   :  { %vm869_vm0 = vcmp.ge.f32.partialorder %v868_v1, %v1473_v0 }
 0xe25   :  { %v870_v29 = vsel %vm869_vm0, %v857_v24, %v856_v22 }
 0xe26   :  { %v871_v23 = vor.u32 4, %v870_v29 }
 0xe28   :  { %vm872_vm1 = vcmp.ge.s32.totalorder %v1460_v57, %v871_v23  ;;  %vm873_vm2 = vcmp.ge.s32.totalorder %v1462_v58, %v871_v23 }
 0xe29   :  { %v1065_v28 = vsel %vm872_vm1, 1.0, %v1269_v38  ;;  %v1066_v31 = vsel %vm873_vm2, 1.0, %v1269_v38  ;;  %vm960_vm1 = vcmp.gt.f32.partialorder %v1470_v61, 0.0 }
 0xe2a   :  { %v878_v32 = vsel %vm150_vm4, %v1065_v28, 0.0  ;;  %v879_v34 = vsel %vm150_vm4, %v1066_v31, 0.0  ;;  %v963_v31 = vmax.f32 %v1470_v61, 1e-06 }
 0xe2b   :  { %v880_v35 = vadd.f32 %v879_v34, %v878_v32 }
 0xe2c   :  { %1106 = vrcp.f32 %v963_v31  ;;  %vm970_vm15 = vweird.f32 %v963_v31 }
 0xe2d   :  { %881 = vadd.xlane.f32.xlu2 %v880_v35 }
 0xea0   :  { %v882_v37 = vpop.xlane.xlu2 %881 }
 0xea1   :  { %vm883_vm3 = vcmp.ge.f32.partialorder %v882_v37, %v1473_v0 }
 0xea2   :  { %v884_v52 = vsel %vm883_vm3, %v871_v23, %v870_v29 }
 0xea3   :  { %v885_v3 = vor.u32 2, %v884_v52 }
 0xea5   :  { %vm886_vm5 = vcmp.ge.s32.totalorder %v1460_v57, %v885_v3  ;;  %vm887_vm7 = vcmp.ge.s32.totalorder %v1462_v58, %v885_v3 }
 0xea6   :  { %v1067_v40 = vsel %vm886_vm5, 1.0, %v1269_v38  ;;  %v1068_v5 = vsel %vm887_vm7, 1.0, %v1269_v38 }
 0xea7   :  { %v892_v41 = vsel %vm150_vm4, %v1067_v40, 0.0  ;;  %v893_v43 = vsel %vm150_vm4, %v1068_v5, 0.0  ;;  %v976_v40 = vand.u32 2147483648, %v963_v31 }
 0xea8   :  { %v894_v6 = vadd.f32 %v893_v43, %v892_v41 }
 0xeaa   :  { %895 = vadd.xlane.f32.xlu0 %v894_v6  ;;  %v974_v6 = vand.u32 2147483647, %v963_v31 }
 0xeac   :  { %vm975_vm2 = vcmp.eq.f32.partialorder %v974_v6, 8.507059e+37 }
 0xeb2   :  { %451 = vadd.xlane.f32.xlu0 %v450_v9 }
 0xeba   :  { %289 = vadd.xlane.f32.xlu0 %v288_v36 }
 0xf1d   :  { %v896_v44 = vpop.xlane.xlu0 %895 }
 0xf1e   :  { %vm897_vm8 = vcmp.ge.f32.partialorder %v896_v44, %v1473_v0 }
 0xf1f   :  { %v898_v7 = vsel %vm897_vm8, %v885_v3, %v884_v52 }
 0xf20   :  { %v899_v45 = vor.u32 1, %v898_v7 }
 0xf22   :  { %vm900_vm9 = vcmp.ge.s32.totalorder %v1460_v57, %v899_v45  ;;  %vm901_vm10 = vcmp.ge.s32.totalorder %v1462_v58, %v899_v45 }
 0xf23   :  { %v1069_v42 = vsel %vm900_vm9, 1.0, %v1269_v38  ;;  %v1070_v19 = vsel %vm901_vm10, 1.0, %v1269_v38 }
 0xf24   :  { %v906_v47 = vsel %vm150_vm4, %v1069_v42, 0.0  ;;  %v907_v48 = vsel %vm150_vm4, %v1070_v19, 0.0 }
 0xf25   :  { %v908_v49 = vadd.f32 %v907_v48, %v906_v47  ;;  %v1073_v47 = vsel %vm960_vm1, 1.0, %v1269_v38 }
 0xf27   :  { %909 = vadd.xlane.f32.xlu1 %v908_v49 }
 0xf9a   :  { %v910_v10 = vpop.xlane.xlu1 %909 }
 0xf9b   :  { %vm911_vm11 = vcmp.ge.f32.partialorder %v910_v10, %v1473_v0 }
 0xf9c   :  { %v912_v33 = vsel %vm911_vm11, %v899_v45, %v898_v7  ;;  %v977_v45 = vor.u32 1.1754944e-38, %v976_v40 }
 0xf9d   :  { %vm913_vm6 = vcmp.gt.s32.totalorder %v1460_v57, %v912_v33  ;;  %vm914_vm12 = vcmp.gt.s32.totalorder %v1462_v58, %v912_v33  ;;  %vm941_vm13 = vcmp.eq.s32.totalorder %v1460_v57, %v912_v33  ;;  %vm942_vm14 = vcmp.eq.s32.totalorder %v1462_v58, %v912_v33  ;;  %v452_v57 = vpop.xlane.xlu0 %451 }
 0xf9e   :  { %v1071_v56 = vsel %vm913_vm6, 1.0, %v1269_v38  ;;  %v1072_v11 = vsel %vm914_vm12, 1.0, %v1269_v38 }
 0xf9f   :  { %v919_v12 = vsel %vm150_vm4, %v1071_v56, 0.0  ;;  %v920_v53 = vsel %vm150_vm4, %v1072_v11, 0.0  ;;  %v926_v13 = vrot.slane %v1072_v11, 6 }
 0xfa0   :  { %v921_v54 = vadd.f32 %v920_v53, %v919_v12 }
 0xfa1   :  { %v927_v15 = vsel %vm150_vm4, %v1071_v56, %v926_v13 }
 0xfa2   :  { %v929_v17 = vmul.f32 %v927_v15, %v1453_v62  ;;  %922 = vadd.xlane.f32.xlu2 %v921_v54 }
 0xfa4   :  { %931 = vst [vmem:[#allocation1] ss:$4 sm:$0xff] %v929_v17 }
 0xfa5   :  { %v290_v44 = vpop.xlane.xlu0 %289 }
 0xfab   :  { %v932_v18 = vld.sshfl [vmem:[#allocation1] sm:$0xff pattern:$0x73625140]  ;;  %v933_v22 = vld.sshfl [vmem:[#allocation1 + $0x8] sm:$0xff pattern:$0x73625140] }
 0xfac   :  { %v936_v24 = vsel %vm150_vm4, %v932_v18, 0.0  ;;  %v937_v21 = vsel %vm150_vm4, %v933_v22, 0.0  ;;  %943 = vst [vmem:[#allocation1] ss:$4 sm:$0xff] %v1453_v62  ;;  %v1107_v62 = vpop.eup %1106 }
 0xfad   :  { %v938_v20 = vadd.f32 %v937_v21, %v936_v24  ;;  %v966_v32 = vmul.f32 %v1107_v62, %v963_v31  ;;  %vm971_vm0 = vweird.f32 %v1107_v62 }
 0xfaf   :  { %939 = vadd.xlane.f32.xlu1 %v938_v20  ;;  %v967_v35 = vsub.f32 1.0, %v966_v32 }
 0xfb1   :  { %v968_v37 = vmul.f32 %v1107_v62, %v967_v35 }
 0xfb3   :  { %v944_v25 = vld.sshfl [vmem:[#allocation1] sm:$0xff pattern:$0x73625140]  ;;  %v945_v26 = vld.sshfl [vmem:[#allocation1 + $0x8] sm:$0xff pattern:$0x73625140]  ;;  %v969_v43 = vadd.f32 %v1107_v62, %v968_v37 }
 0xfb4   :  { %v948_v27 = vsel %vm941_vm13, %v944_v25, 0.0  ;;  %v949_v1 = vsel %vm942_vm14, %v945_v26, 0.0 }
 0xfb5   :  { %v950_v29 = vsel %vm150_vm4, %v948_v27, -inf  ;;  %v951_v23 = vsel %vm150_vm4, %v949_v1, -inf  ;;  %vm972_vm4 = vmor %vm970_vm15, %vm971_vm0 }
 0xfb6   :  { %v952_v28 = vmax.f32 %v950_v29, %v951_v23  ;;  %v973_v42 = vsel %vm972_vm4, %v1107_v62, %v969_v43 }
 0xfb7   :  { %v978_v48 = vsel %vm975_vm2, %v977_v45, %v973_v42 }
 0xfb8   :  { %953 = vmax.xlane.f32.xlu2 %v952_v28 }
0x1015   :  { %v923_v34 = vpop.xlane.xlu2 %922 }
0x1016   :  { %v956_v52 = vsub.f32 %v1473_v0, %v923_v34 }
0x1022   :  { %v940_v58 = vpop.xlane.xlu1 %939 }
0x1023   :  { %v955_v5 = vadd.f32 %v940_v58, %v452_v57 }
0x102b   :  { %v954_v3 = vpop.xlane.xlu2 %953 }
0x102c   :  { %v957_v41 = vmul.f32 %v956_v52, %v954_v3 }
0x102e   :  { %v958_v7 = vadd.f32 %v957_v41, %v955_v5 }
0x1030   :  { %v959_v19 = vadd.f32 %v958_v7, %v290_v44 }
0x1032   :  { %v964_v0 = vmul.f32 %v1073_v47, %v959_v19 }
0x1034   :  { %v979_v49 = vmul.f32 %v978_v48, %v964_v0 }
0x1036   :  { %980 = vst [vmem:[#allocation11] sm:$0x3] %v979_v49 }
0x1037   :  { %991 = dma.vmem_to_hbm [thread:$0]  %s987_s4, 32, %s989_s21, [#allocation4]  }
0x1038   :  { %1258 = dma.done.wait [#allocation4], 32  }
0x1039   :  { %1259 = vsyncadd [#allocation4], 4294967264 }
0x103a   :  { %996 = vsyncpa [#allocation3], 1 }
0x103b   :  { %997 = vsyncpa [#allocation6], 1 }
0x103c   :  { %998 = vsyncpa [#allocation9], 1 }
0x103d   :  { %999 = vsyncpa [#allocation4], 1 }

</bundles_post_ra>
